<compile_context>
chip_gen: v6e
topology: v6e:2x2x1
jax: 0.10.0
libtpu: 0.0.40
codegen_flags: <defaults>
</compile_context>

<pallas_src>
import functools

import jax
import jax.numpy as jnp
from jax.experimental import pallas as pl
from jax.experimental.pallas import tpu as pltpu

LANES = 128


def _round_up_lanes(n):
    return pl.cdiv(n, LANES) * LANES


def _gat_fused_kernel(x_ref, adj_ref, *wb_and_out, layers, negative_slope, final_c_out):
    """Fused 3-layer GAT forward. Refs: x, adj, (w1,b1,w2,b2,w3,b3), out."""
    out_ref = wb_and_out[-1]
    wb_refs = wb_and_out[:-1]

    n = adj_ref.shape[0]

    # Edge mask built ONCE and reused by every layer / head.
    # adj[i, j] = 1 iff edge j -> i; PyG adds self-loops, so every row has >= 1 edge.
    valid = adj_ref[...].astype(jnp.float32) > 0.0            # [N, N] bool

    h_act = x_ref[...]                                        # [N, cin_pad] bf16
    n_layers = len(layers)

    for li, meta in enumerate(layers):
        w_ref = wb_refs[2 * li]                               # [cin_pad, P] bf16
        b_ref = wb_refs[2 * li + 1]                           # [1, c_pad]   f32
        heads = meta['heads']
        f = meta['f']
        hf = heads * f
        p_width = w_ref.shape[1]
        c_pad = b_ref.shape[1]
        last = li == n_layers - 1

        # ONE fused projection per layer (MXU, bf16 operands, f32 accumulate):
        # features for all heads + every head's src/dst attention logits.
        xp = jnp.dot(h_act, w_ref[...], preferred_element_type=jnp.float32)   # [N, P]

        # Hoisted sublane->lane relayout: transpose the lane-aligned projection block
        # once per layer; per-head src logits are then cheap sublane-row slices.
        xp_t = xp.T                                           # [P, N] f32

        col = jax.lax.broadcasted_iota(jnp.int32, (1, p_width), 1)
        out_acc = jnp.zeros((n, p_width), jnp.float32)

        for h in range(heads):                                # static unroll, H is small
            a_dst = xp[:, hf + heads + h:hf + heads + h + 1]  # [N, 1] target logits
            a_src = xp_t[hf + h:hf + h + 1, :]                # [1, N] source logits

            # e[i, j] = leaky_relu(a_dst[i] + a_src[j]), masked to existing edges.
            e = a_dst + a_src                                 # [N, N]
            e = jnp.where(e > 0, e, negative_slope * e)
            e = jnp.where(valid, e, -1e30)

            # Masked softmax over incoming edges; masked entries underflow to exact 0.
            m = jnp.max(e, axis=-1, keepdims=True)
            pexp = jnp.exp(e - m)                             # [N, N] (EUP)
            inv = pl.reciprocal(jnp.sum(pexp, axis=-1, keepdims=True), approx=True)
            p_norm = (pexp * inv).astype(jnp.bfloat16)        # normalize before bf16 cast

            # Head-masked lane-dense feature slab: the matmul result lands directly in
            # lanes [h*F, (h+1)*F) of the accumulator (no concat, no narrow stores).
            head_mask = (col >= h * f) & (col < (h + 1) * f)
            feat_h = jnp.where(head_mask, xp, 0.0).astype(jnp.bfloat16)
            out_acc = out_acc + jnp.dot(p_norm, feat_h,
                                        preferred_element_type=jnp.float32)

        if meta['concat']:
            out = out_acc[:, :c_pad]                          # heads already concatenated
        else:
            # Mean over heads (final GATConv has concat=False): fold head blocks.
            folded = out_acc[:, :f]
            for h in range(1, heads):
                folded = folded + out_acc[:, h * f:(h + 1) * f]
            folded = folded * (1.0 / heads)
            out = jnp.concatenate(
                [folded, jnp.zeros((n, c_pad - f), jnp.float32)], axis=-1)

        out = out + b_ref[...]                                # bias padded to [1, c_pad]

        if not last:
            out = jnp.maximum(out, 0.0)                       # relu_; dropout = identity (eval)
            h_act = out.astype(jnp.bfloat16)                  # stays in VMEM, never hits HBM
        else:
            # F.log_softmax(x, dim=1) over the valid (un-padded) lanes.
            ocol = jax.lax.broadcasted_iota(jnp.int32, (1, c_pad), 1)
            vmask = ocol < final_c_out
            mx = jnp.max(jnp.where(vmask, out, -1e30), axis=-1, keepdims=True)
            ex = jnp.where(vmask, jnp.exp(out - mx), 0.0)
            lse = jnp.log(jnp.sum(ex, axis=-1, keepdims=True)) + mx
            out_ref[...] = (out - lse).astype(out_ref.dtype)


def _fused_vmem_bytes(n, in_width, params):
    """Rough resident-VMEM footprint of the fused kernel (inputs + working set)."""
    by = n * n                                   # adj int8
    by += n * in_width * 2                       # padded x bf16
    for p in params:
        by += p['w_aug'].size * 2 + p['bias_pad'].size * 4
    by += n * params[-1]['c_pad'] * 4            # f32 output
    pmax = max(p['w_aug'].shape[1] for p in params)
    by += 5 * n * pmax * 4                       # xp, xp_t, out_acc, feat slab, activation
    by += 3 * n * n * 4                          # e / pexp / mask working set
    return by


def gat_forward(params, x, adj_i8, *, in_width, out_channel, negative_slope=0.2):
    """x: [N, C_in] node features; adj_i8: [N, N] int8 mask adj[dst, src] w/ self-loops."""
    n, cin = x.shape
    x_pad = jnp.pad(x, ((0, 0), (0, in_width - cin))).astype(jnp.bfloat16)
    c_pad_last = params[-1]['c_pad']

    est = _fused_vmem_bytes(n, in_width, params)
    budget = 48 * 1024 * 1024                    # headroom under v7x's 64 MiB physical VMEM
    assert est <= budget, (
        f"graph footprint {est} B exceeds fused-kernel VMEM budget; "
        "needs the source-tiled per-layer variant")  # TODO(synk): tiled large-graph path
    vmem_limit = min(budget, max(2 * est, 16 * 1024 * 1024))

    layer_meta = tuple(dict(heads=p['heads'], f=p['f'], concat=p['concat'])
                       for p in params)
    kernel = functools.partial(_gat_fused_kernel, layers=layer_meta,
                               negative_slope=negative_slope, final_c_out=out_channel)

    args = [x_pad, adj_i8]
    for p in params:
        args.append(p['w_aug'])
        args.append(p['bias_pad'])

    out = pl.pallas_call(
        kernel,
        out_shape=jax.ShapeDtypeStruct((n, c_pad_last), jnp.float32),
        compiler_params=pltpu.CompilerParams(vmem_limit_bytes=vmem_limit),
    )(*args)
    return out[:, :out_channel]


def init_gat_params(key, in_channel, out_channel, hidden_channel, nlayers,
                    heads_in, heads_out):
    """Glorot-style init matching GATConv shapes, pre-fused & lane-padded for the kernel."""
    layer_dims = [(in_channel, hidden_channel, heads_in, True)]
    for _ in range(nlayers - 2):
        layer_dims.append((hidden_channel * heads_in, hidden_channel, heads_in, True))
    layer_dims.append((hidden_channel * heads_in, out_channel, heads_out, False))

    params = []
    in_width = _round_up_lanes(in_channel)
    for (cin, f, h, concat) in layer_dims:
        key, k1, k2, k3 = jax.random.split(key, 4)
        limit_w = (6.0 / (cin + h * f)) ** 0.5
        w = jax.random.uniform(k1, (cin, h * f), jnp.float32, -limit_w, limit_w)
        limit_a = (6.0 / (1.0 + f)) ** 0.5
        att_src = jax.random.uniform(k2, (h, f), jnp.float32, -limit_a, limit_a)
        att_dst = jax.random.uniform(k3, (h, f), jnp.float32, -limit_a, limit_a)
        c_out = h * f if concat else f
        bias = jnp.zeros((c_out,), jnp.float32)              # GATConv bias init = zeros

        # Fuse attention projections into W: extra 2H columns so x@W_aug yields
        # features AND every head's alpha_src / alpha_dst in one MXU matmul.
        w3 = w.reshape(cin, h, f)
        src_cols = jnp.einsum('chf,hf->ch', w3, att_src)     # [cin, H]
        dst_cols = jnp.einsum('chf,hf->ch', w3, att_dst)     # [cin, H]
        w_aug = jnp.concatenate([w, src_cols, dst_cols], axis=1)   # [cin, H*F + 2H]
        p_width = _round_up_lanes(h * f + 2 * h)
        w_aug = jnp.pad(w_aug, ((0, in_width - cin),
                                (0, p_width - (h * f + 2 * h))))
        c_pad = _round_up_lanes(c_out)
        bias_pad = jnp.pad(bias[None, :], ((0, 0), (0, c_pad - c_out)))

        params.append(dict(w_aug=w_aug.astype(jnp.bfloat16), bias_pad=bias_pad,
                           heads=h, f=f, concat=concat, c_out=c_out, c_pad=c_pad))
        in_width = c_pad
    return params, _round_up_lanes(in_channel)


if __name__ == "__main__":
    key = jax.random.PRNGKey(0)
    k_x, k_src, k_dst, k_p = jax.random.split(key, 4)

    # Small, deterministic problem consistent with the module's forward.
    N = 32
    in_channel = 16
    hidden_channel = 16
    out_channel = 8
    heads_in = 4
    heads_out = 2
    nlayers = 3
    num_edges = 64

    x = jax.random.normal(k_x, (N, in_channel), jnp.float32)
    src = jax.random.randint(k_src, (num_edges,), 0, N)
    dst = jax.random.randint(k_dst, (num_edges,), 0, N)
    edge_index = jnp.stack([src, dst])  # [2, E]: row 0 = source, row 1 = target

    # Dense adjacency mask (int8, exact 0/1): adj[target, source] = 1, plus self-loops.
    adj = jnp.zeros((N, N), jnp.float32).at[dst, src].set(1.0)
    adj = adj.at[jnp.arange(N), jnp.arange(N)].set(1.0)
    adj = adj.astype(jnp.int8)

    params, in_width = init_gat_params(k_p, in_channel, out_channel, hidden_channel,
                                       nlayers, heads_in, heads_out)

    out = gat_forward(params, x, adj, in_width=in_width, out_channel=out_channel)
    jax.block_until_ready(out)
    assert out.shape == (N, out_channel)
    assert bool(jnp.all(jnp.isfinite(out)))
    print("KERNEL_OK")
</pallas_src>

<mosaic_0001>
module attributes {stable_mosaic.version = 11 : i64} {
  func.func @_gat_fused_kernel(%arg0: memref<32x128xbf16, #tpu.memory_space<vmem>>, %arg1: memref<32x32xi8, #tpu.memory_space<vmem>>, %arg2: memref<128x128xbf16, #tpu.memory_space<vmem>>, %arg3: memref<1x128xf32, #tpu.memory_space<vmem>>, %arg4: memref<128x128xbf16, #tpu.memory_space<vmem>>, %arg5: memref<1x128xf32, #tpu.memory_space<vmem>>, %arg6: memref<128x128xbf16, #tpu.memory_space<vmem>>, %arg7: memref<1x128xf32, #tpu.memory_space<vmem>>, %arg8: memref<32x128xf32, #tpu.memory_space<vmem>>) attributes {dimension_semantics = [], scalar_prefetch = 0 : i64, scratch_operands = 0 : i64, tpu.core_type = #tpu.core_type<tc>} {
    %c0 = arith.constant 0 : index
    %c0_0 = arith.constant 0 : index
    %0 = vector.load %arg1[%c0, %c0_0] : memref<32x32xi8, #tpu.memory_space<vmem>>, vector<32x32xi8>
    %1 = arith.sitofp %0 : vector<32x32xi8> to vector<32x32xf32>
    %cst = arith.constant 0.000000e+00 : f32
    %2 = vector.broadcast %cst : f32 to vector<32x32xf32>
    %3 = arith.cmpf ogt, %1, %2 : vector<32x32xf32>
    %c0_1 = arith.constant 0 : index
    %c0_2 = arith.constant 0 : index
    %4 = vector.load %arg0[%c0_1, %c0_2] : memref<32x128xbf16, #tpu.memory_space<vmem>>, vector<32x128xbf16>
    %c0_3 = arith.constant 0 : index
    %c0_4 = arith.constant 0 : index
    %5 = vector.load %arg2[%c0_3, %c0_4] : memref<128x128xbf16, #tpu.memory_space<vmem>>, vector<128x128xbf16>
    %cst_5 = arith.constant dense<0.000000e+00> : vector<32x128xf32>
    %6 = tpu.matmul %4, %5, %cst_5 {dimension_numbers = #tpu.dot_dimension_numbers<[1], [0], [0], [1], [0, 0, 1, 1], [], []>} : vector<32x128xbf16>, vector<128x128xbf16>, vector<32x128xf32> -> vector<32x128xf32>
    %7 = tpu.transpose %6, [1, 0] : vector<32x128xf32> -> vector<128x32xf32>
    %8 = tpu.iota {dimensions = array<i32: 1>} : vector<1x128xi32>
    %cst_6 = arith.constant 0.000000e+00 : f32
    %9 = vector.broadcast %cst_6 : f32 to vector<32x128xf32>
    %10 = vector.extract_strided_slice %6 {offsets = [0, 68], sizes = [32, 1], strides = [1, 1]} : vector<32x128xf32> to vector<32x1xf32>
    %11 = vector.extract_strided_slice %7 {offsets = [64, 0], sizes = [1, 32], strides = [1, 1]} : vector<128x32xf32> to vector<1x32xf32>
    %12 = vector.broadcast %10 : vector<32x1xf32> to vector<32x32xf32>
    %13 = vector.broadcast %11 : vector<1x32xf32> to vector<32x32xf32>
    %14 = arith.addf %12, %13 : vector<32x32xf32>
    %cst_7 = arith.constant 0.000000e+00 : f32
    %15 = vector.broadcast %cst_7 : f32 to vector<32x32xf32>
    %16 = arith.cmpf ogt, %14, %15 : vector<32x32xf32>
    %cst_8 = arith.constant 2.000000e-01 : f32
    %17 = vector.broadcast %cst_8 : f32 to vector<32x32xf32>
    %18 = arith.mulf %17, %14 : vector<32x32xf32>
    %19 = arith.select %16, %14, %18 : vector<32x32xi1>, vector<32x32xf32>
    %cst_9 = arith.constant -1.000000e+30 : f32
    %20 = vector.broadcast %cst_9 : f32 to vector<32x32xf32>
    %21 = arith.select %3, %19, %20 : vector<32x32xi1>, vector<32x32xf32>
    %cst_10 = arith.constant dense<0xFF800000> : vector<32xf32>
    %22 = vector.multi_reduction <maximumf>, %21, %cst_10 [1] : vector<32x32xf32> to vector<32xf32>
    %23 = vector.shape_cast %22 : vector<32xf32> to vector<32x1xf32>
    %24 = vector.broadcast %23 : vector<32x1xf32> to vector<32x32xf32>
    %25 = arith.subf %21, %24 : vector<32x32xf32>
    %26 = math.exp %25 : vector<32x32xf32>
    %cst_11 = arith.constant dense<0.000000e+00> : vector<32xf32>
    %27 = vector.multi_reduction <add>, %26, %cst_11 [1] : vector<32x32xf32> to vector<32xf32>
    %28 = vector.shape_cast %27 : vector<32xf32> to vector<32x1xf32>
    %29 = tpu.reciprocal %28 {approx = true} : vector<32x1xf32> -> vector<32x1xf32>
    %30 = vector.broadcast %29 : vector<32x1xf32> to vector<32x32xf32>
    %31 = arith.mulf %26, %30 : vector<32x32xf32>
    %32 = arith.truncf %31 : vector<32x32xf32> to vector<32x32xbf16>
    %c0_i32 = arith.constant 0 : i32
    %33 = vector.broadcast %c0_i32 : i32 to vector<1x128xi32>
    %34 = arith.cmpi sge, %8, %33 : vector<1x128xi32>
    %c16_i32 = arith.constant 16 : i32
    %35 = vector.broadcast %c16_i32 : i32 to vector<1x128xi32>
    %36 = arith.cmpi slt, %8, %35 : vector<1x128xi32>
    %37 = arith.andi %34, %36 : vector<1x128xi1>
    %cst_12 = arith.constant 0.000000e+00 : f32
    %38 = vector.shape_cast %37 : vector<1x128xi1> to vector<1x128xi1>
    %39 = vector.broadcast %38 : vector<1x128xi1> to vector<32x128xi1>
    %40 = vector.broadcast %cst_12 : f32 to vector<32x128xf32>
    %41 = arith.select %39, %6, %40 : vector<32x128xi1>, vector<32x128xf32>
    %42 = arith.truncf %41 : vector<32x128xf32> to vector<32x128xbf16>
    %cst_13 = arith.constant dense<0.000000e+00> : vector<32x128xf32>
    %43 = tpu.matmul %32, %42, %cst_13 {dimension_numbers = #tpu.dot_dimension_numbers<[1], [0], [0], [1], [0, 0, 1, 1], [], []>} : vector<32x32xbf16>, vector<32x128xbf16>, vector<32x128xf32> -> vector<32x128xf32>
    %44 = arith.addf %9, %43 : vector<32x128xf32>
    %45 = vector.extract_strided_slice %6 {offsets = [0, 69], sizes = [32, 1], strides = [1, 1]} : vector<32x128xf32> to vector<32x1xf32>
    %46 = vector.extract_strided_slice %7 {offsets = [65, 0], sizes = [1, 32], strides = [1, 1]} : vector<128x32xf32> to vector<1x32xf32>
    %47 = vector.broadcast %45 : vector<32x1xf32> to vector<32x32xf32>
    %48 = vector.broadcast %46 : vector<1x32xf32> to vector<32x32xf32>
    %49 = arith.addf %47, %48 : vector<32x32xf32>
    %cst_14 = arith.constant 0.000000e+00 : f32
    %50 = vector.broadcast %cst_14 : f32 to vector<32x32xf32>
    %51 = arith.cmpf ogt, %49, %50 : vector<32x32xf32>
    %cst_15 = arith.constant 2.000000e-01 : f32
    %52 = vector.broadcast %cst_15 : f32 to vector<32x32xf32>
    %53 = arith.mulf %52, %49 : vector<32x32xf32>
    %54 = arith.select %51, %49, %53 : vector<32x32xi1>, vector<32x32xf32>
    %cst_16 = arith.constant -1.000000e+30 : f32
    %55 = vector.broadcast %cst_16 : f32 to vector<32x32xf32>
    %56 = arith.select %3, %54, %55 : vector<32x32xi1>, vector<32x32xf32>
    %cst_17 = arith.constant dense<0xFF800000> : vector<32xf32>
    %57 = vector.multi_reduction <maximumf>, %56, %cst_17 [1] : vector<32x32xf32> to vector<32xf32>
    %58 = vector.shape_cast %57 : vector<32xf32> to vector<32x1xf32>
    %59 = vector.broadcast %58 : vector<32x1xf32> to vector<32x32xf32>
    %60 = arith.subf %56, %59 : vector<32x32xf32>
    %61 = math.exp %60 : vector<32x32xf32>
    %cst_18 = arith.constant dense<0.000000e+00> : vector<32xf32>
    %62 = vector.multi_reduction <add>, %61, %cst_18 [1] : vector<32x32xf32> to vector<32xf32>
    %63 = vector.shape_cast %62 : vector<32xf32> to vector<32x1xf32>
    %64 = tpu.reciprocal %63 {approx = true} : vector<32x1xf32> -> vector<32x1xf32>
    %65 = vector.broadcast %64 : vector<32x1xf32> to vector<32x32xf32>
    %66 = arith.mulf %61, %65 : vector<32x32xf32>
    %67 = arith.truncf %66 : vector<32x32xf32> to vector<32x32xbf16>
    %c16_i32_19 = arith.constant 16 : i32
    %68 = vector.broadcast %c16_i32_19 : i32 to vector<1x128xi32>
    %69 = arith.cmpi sge, %8, %68 : vector<1x128xi32>
    %c32_i32 = arith.constant 32 : i32
    %70 = vector.broadcast %c32_i32 : i32 to vector<1x128xi32>
    %71 = arith.cmpi slt, %8, %70 : vector<1x128xi32>
    %72 = arith.andi %69, %71 : vector<1x128xi1>
    %cst_20 = arith.constant 0.000000e+00 : f32
    %73 = vector.shape_cast %72 : vector<1x128xi1> to vector<1x128xi1>
    %74 = vector.broadcast %73 : vector<1x128xi1> to vector<32x128xi1>
    %75 = vector.broadcast %cst_20 : f32 to vector<32x128xf32>
    %76 = arith.select %74, %6, %75 : vector<32x128xi1>, vector<32x128xf32>
    %77 = arith.truncf %76 : vector<32x128xf32> to vector<32x128xbf16>
    %cst_21 = arith.constant dense<0.000000e+00> : vector<32x128xf32>
    %78 = tpu.matmul %67, %77, %cst_21 {dimension_numbers = #tpu.dot_dimension_numbers<[1], [0], [0], [1], [0, 0, 1, 1], [], []>} : vector<32x32xbf16>, vector<32x128xbf16>, vector<32x128xf32> -> vector<32x128xf32>
    %79 = arith.addf %44, %78 : vector<32x128xf32>
    %80 = vector.extract_strided_slice %6 {offsets = [0, 70], sizes = [32, 1], strides = [1, 1]} : vector<32x128xf32> to vector<32x1xf32>
    %81 = vector.extract_strided_slice %7 {offsets = [66, 0], sizes = [1, 32], strides = [1, 1]} : vector<128x32xf32> to vector<1x32xf32>
    %82 = vector.broadcast %80 : vector<32x1xf32> to vector<32x32xf32>
    %83 = vector.broadcast %81 : vector<1x32xf32> to vector<32x32xf32>
    %84 = arith.addf %82, %83 : vector<32x32xf32>
    %cst_22 = arith.constant 0.000000e+00 : f32
    %85 = vector.broadcast %cst_22 : f32 to vector<32x32xf32>
    %86 = arith.cmpf ogt, %84, %85 : vector<32x32xf32>
    %cst_23 = arith.constant 2.000000e-01 : f32
    %87 = vector.broadcast %cst_23 : f32 to vector<32x32xf32>
    %88 = arith.mulf %87, %84 : vector<32x32xf32>
    %89 = arith.select %86, %84, %88 : vector<32x32xi1>, vector<32x32xf32>
    %cst_24 = arith.constant -1.000000e+30 : f32
    %90 = vector.broadcast %cst_24 : f32 to vector<32x32xf32>
    %91 = arith.select %3, %89, %90 : vector<32x32xi1>, vector<32x32xf32>
    %cst_25 = arith.constant dense<0xFF800000> : vector<32xf32>
    %92 = vector.multi_reduction <maximumf>, %91, %cst_25 [1] : vector<32x32xf32> to vector<32xf32>
    %93 = vector.shape_cast %92 : vector<32xf32> to vector<32x1xf32>
    %94 = vector.broadcast %93 : vector<32x1xf32> to vector<32x32xf32>
    %95 = arith.subf %91, %94 : vector<32x32xf32>
    %96 = math.exp %95 : vector<32x32xf32>
    %cst_26 = arith.constant dense<0.000000e+00> : vector<32xf32>
    %97 = vector.multi_reduction <add>, %96, %cst_26 [1] : vector<32x32xf32> to vector<32xf32>
    %98 = vector.shape_cast %97 : vector<32xf32> to vector<32x1xf32>
    %99 = tpu.reciprocal %98 {approx = true} : vector<32x1xf32> -> vector<32x1xf32>
    %100 = vector.broadcast %99 : vector<32x1xf32> to vector<32x32xf32>
    %101 = arith.mulf %96, %100 : vector<32x32xf32>
    %102 = arith.truncf %101 : vector<32x32xf32> to vector<32x32xbf16>
    %c32_i32_27 = arith.constant 32 : i32
    %103 = vector.broadcast %c32_i32_27 : i32 to vector<1x128xi32>
    %104 = arith.cmpi sge, %8, %103 : vector<1x128xi32>
    %c48_i32 = arith.constant 48 : i32
    %105 = vector.broadcast %c48_i32 : i32 to vector<1x128xi32>
    %106 = arith.cmpi slt, %8, %105 : vector<1x128xi32>
    %107 = arith.andi %104, %106 : vector<1x128xi1>
    %cst_28 = arith.constant 0.000000e+00 : f32
    %108 = vector.shape_cast %107 : vector<1x128xi1> to vector<1x128xi1>
    %109 = vector.broadcast %108 : vector<1x128xi1> to vector<32x128xi1>
    %110 = vector.broadcast %cst_28 : f32 to vector<32x128xf32>
    %111 = arith.select %109, %6, %110 : vector<32x128xi1>, vector<32x128xf32>
    %112 = arith.truncf %111 : vector<32x128xf32> to vector<32x128xbf16>
    %cst_29 = arith.constant dense<0.000000e+00> : vector<32x128xf32>
    %113 = tpu.matmul %102, %112, %cst_29 {dimension_numbers = #tpu.dot_dimension_numbers<[1], [0], [0], [1], [0, 0, 1, 1], [], []>} : vector<32x32xbf16>, vector<32x128xbf16>, vector<32x128xf32> -> vector<32x128xf32>
    %114 = arith.addf %79, %113 : vector<32x128xf32>
    %115 = vector.extract_strided_slice %6 {offsets = [0, 71], sizes = [32, 1], strides = [1, 1]} : vector<32x128xf32> to vector<32x1xf32>
    %116 = vector.extract_strided_slice %7 {offsets = [67, 0], sizes = [1, 32], strides = [1, 1]} : vector<128x32xf32> to vector<1x32xf32>
    %117 = vector.broadcast %115 : vector<32x1xf32> to vector<32x32xf32>
    %118 = vector.broadcast %116 : vector<1x32xf32> to vector<32x32xf32>
    %119 = arith.addf %117, %118 : vector<32x32xf32>
    %cst_30 = arith.constant 0.000000e+00 : f32
    %120 = vector.broadcast %cst_30 : f32 to vector<32x32xf32>
    %121 = arith.cmpf ogt, %119, %120 : vector<32x32xf32>
    %cst_31 = arith.constant 2.000000e-01 : f32
    %122 = vector.broadcast %cst_31 : f32 to vector<32x32xf32>
    %123 = arith.mulf %122, %119 : vector<32x32xf32>
    %124 = arith.select %121, %119, %123 : vector<32x32xi1>, vector<32x32xf32>
    %cst_32 = arith.constant -1.000000e+30 : f32
    %125 = vector.broadcast %cst_32 : f32 to vector<32x32xf32>
    %126 = arith.select %3, %124, %125 : vector<32x32xi1>, vector<32x32xf32>
    %cst_33 = arith.constant dense<0xFF800000> : vector<32xf32>
    %127 = vector.multi_reduction <maximumf>, %126, %cst_33 [1] : vector<32x32xf32> to vector<32xf32>
    %128 = vector.shape_cast %127 : vector<32xf32> to vector<32x1xf32>
    %129 = vector.broadcast %128 : vector<32x1xf32> to vector<32x32xf32>
    %130 = arith.subf %126, %129 : vector<32x32xf32>
    %131 = math.exp %130 : vector<32x32xf32>
    %cst_34 = arith.constant dense<0.000000e+00> : vector<32xf32>
    %132 = vector.multi_reduction <add>, %131, %cst_34 [1] : vector<32x32xf32> to vector<32xf32>
    %133 = vector.shape_cast %132 : vector<32xf32> to vector<32x1xf32>
    %134 = tpu.reciprocal %133 {approx = true} : vector<32x1xf32> -> vector<32x1xf32>
    %135 = vector.broadcast %134 : vector<32x1xf32> to vector<32x32xf32>
    %136 = arith.mulf %131, %135 : vector<32x32xf32>
    %137 = arith.truncf %136 : vector<32x32xf32> to vector<32x32xbf16>
    %c48_i32_35 = arith.constant 48 : i32
    %138 = vector.broadcast %c48_i32_35 : i32 to vector<1x128xi32>
    %139 = arith.cmpi sge, %8, %138 : vector<1x128xi32>
    %c64_i32 = arith.constant 64 : i32
    %140 = vector.broadcast %c64_i32 : i32 to vector<1x128xi32>
    %141 = arith.cmpi slt, %8, %140 : vector<1x128xi32>
    %142 = arith.andi %139, %141 : vector<1x128xi1>
    %cst_36 = arith.constant 0.000000e+00 : f32
    %143 = vector.shape_cast %142 : vector<1x128xi1> to vector<1x128xi1>
    %144 = vector.broadcast %143 : vector<1x128xi1> to vector<32x128xi1>
    %145 = vector.broadcast %cst_36 : f32 to vector<32x128xf32>
    %146 = arith.select %144, %6, %145 : vector<32x128xi1>, vector<32x128xf32>
    %147 = arith.truncf %146 : vector<32x128xf32> to vector<32x128xbf16>
    %cst_37 = arith.constant dense<0.000000e+00> : vector<32x128xf32>
    %148 = tpu.matmul %137, %147, %cst_37 {dimension_numbers = #tpu.dot_dimension_numbers<[1], [0], [0], [1], [0, 0, 1, 1], [], []>} : vector<32x32xbf16>, vector<32x128xbf16>, vector<32x128xf32> -> vector<32x128xf32>
    %149 = arith.addf %114, %148 : vector<32x128xf32>
    %c0_38 = arith.constant 0 : index
    %c0_39 = arith.constant 0 : index
    %150 = vector.load %arg3[%c0_38, %c0_39] : memref<1x128xf32, #tpu.memory_space<vmem>>, vector<1x128xf32>
    %151 = vector.broadcast %150 : vector<1x128xf32> to vector<32x128xf32>
    %152 = arith.addf %149, %151 : vector<32x128xf32>
    %cst_40 = arith.constant 0.000000e+00 : f32
    %153 = vector.broadcast %cst_40 : f32 to vector<32x128xf32>
    %154 = arith.maximumf %152, %153 : vector<32x128xf32>
    %155 = arith.truncf %154 : vector<32x128xf32> to vector<32x128xbf16>
    %c0_41 = arith.constant 0 : index
    %c0_42 = arith.constant 0 : index
    %156 = vector.load %arg4[%c0_41, %c0_42] : memref<128x128xbf16, #tpu.memory_space<vmem>>, vector<128x128xbf16>
    %cst_43 = arith.constant dense<0.000000e+00> : vector<32x128xf32>
    %157 = tpu.matmul %155, %156, %cst_43 {dimension_numbers = #tpu.dot_dimension_numbers<[1], [0], [0], [1], [0, 0, 1, 1], [], []>} : vector<32x128xbf16>, vector<128x128xbf16>, vector<32x128xf32> -> vector<32x128xf32>
    %158 = tpu.transpose %157, [1, 0] : vector<32x128xf32> -> vector<128x32xf32>
    %159 = tpu.iota {dimensions = array<i32: 1>} : vector<1x128xi32>
    %cst_44 = arith.constant 0.000000e+00 : f32
    %160 = vector.broadcast %cst_44 : f32 to vector<32x128xf32>
    %161 = vector.extract_strided_slice %157 {offsets = [0, 68], sizes = [32, 1], strides = [1, 1]} : vector<32x128xf32> to vector<32x1xf32>
    %162 = vector.extract_strided_slice %158 {offsets = [64, 0], sizes = [1, 32], strides = [1, 1]} : vector<128x32xf32> to vector<1x32xf32>
    %163 = vector.broadcast %161 : vector<32x1xf32> to vector<32x32xf32>
    %164 = vector.broadcast %162 : vector<1x32xf32> to vector<32x32xf32>
    %165 = arith.addf %163, %164 : vector<32x32xf32>
    %cst_45 = arith.constant 0.000000e+00 : f32
    %166 = vector.broadcast %cst_45 : f32 to vector<32x32xf32>
    %167 = arith.cmpf ogt, %165, %166 : vector<32x32xf32>
    %cst_46 = arith.constant 2.000000e-01 : f32
    %168 = vector.broadcast %cst_46 : f32 to vector<32x32xf32>
    %169 = arith.mulf %168, %165 : vector<32x32xf32>
    %170 = arith.select %167, %165, %169 : vector<32x32xi1>, vector<32x32xf32>
    %cst_47 = arith.constant -1.000000e+30 : f32
    %171 = vector.broadcast %cst_47 : f32 to vector<32x32xf32>
    %172 = arith.select %3, %170, %171 : vector<32x32xi1>, vector<32x32xf32>
    %cst_48 = arith.constant dense<0xFF800000> : vector<32xf32>
    %173 = vector.multi_reduction <maximumf>, %172, %cst_48 [1] : vector<32x32xf32> to vector<32xf32>
    %174 = vector.shape_cast %173 : vector<32xf32> to vector<32x1xf32>
    %175 = vector.broadcast %174 : vector<32x1xf32> to vector<32x32xf32>
    %176 = arith.subf %172, %175 : vector<32x32xf32>
    %177 = math.exp %176 : vector<32x32xf32>
    %cst_49 = arith.constant dense<0.000000e+00> : vector<32xf32>
    %178 = vector.multi_reduction <add>, %177, %cst_49 [1] : vector<32x32xf32> to vector<32xf32>
    %179 = vector.shape_cast %178 : vector<32xf32> to vector<32x1xf32>
    %180 = tpu.reciprocal %179 {approx = true} : vector<32x1xf32> -> vector<32x1xf32>
    %181 = vector.broadcast %180 : vector<32x1xf32> to vector<32x32xf32>
    %182 = arith.mulf %177, %181 : vector<32x32xf32>
    %183 = arith.truncf %182 : vector<32x32xf32> to vector<32x32xbf16>
    %c0_i32_50 = arith.constant 0 : i32
    %184 = vector.broadcast %c0_i32_50 : i32 to vector<1x128xi32>
    %185 = arith.cmpi sge, %159, %184 : vector<1x128xi32>
    %c16_i32_51 = arith.constant 16 : i32
    %186 = vector.broadcast %c16_i32_51 : i32 to vector<1x128xi32>
    %187 = arith.cmpi slt, %159, %186 : vector<1x128xi32>
    %188 = arith.andi %185, %187 : vector<1x128xi1>
    %cst_52 = arith.constant 0.000000e+00 : f32
    %189 = vector.shape_cast %188 : vector<1x128xi1> to vector<1x128xi1>
    %190 = vector.broadcast %189 : vector<1x128xi1> to vector<32x128xi1>
    %191 = vector.broadcast %cst_52 : f32 to vector<32x128xf32>
    %192 = arith.select %190, %157, %191 : vector<32x128xi1>, vector<32x128xf32>
    %193 = arith.truncf %192 : vector<32x128xf32> to vector<32x128xbf16>
    %cst_53 = arith.constant dense<0.000000e+00> : vector<32x128xf32>
    %194 = tpu.matmul %183, %193, %cst_53 {dimension_numbers = #tpu.dot_dimension_numbers<[1], [0], [0], [1], [0, 0, 1, 1], [], []>} : vector<32x32xbf16>, vector<32x128xbf16>, vector<32x128xf32> -> vector<32x128xf32>
    %195 = arith.addf %160, %194 : vector<32x128xf32>
    %196 = vector.extract_strided_slice %157 {offsets = [0, 69], sizes = [32, 1], strides = [1, 1]} : vector<32x128xf32> to vector<32x1xf32>
    %197 = vector.extract_strided_slice %158 {offsets = [65, 0], sizes = [1, 32], strides = [1, 1]} : vector<128x32xf32> to vector<1x32xf32>
    %198 = vector.broadcast %196 : vector<32x1xf32> to vector<32x32xf32>
    %199 = vector.broadcast %197 : vector<1x32xf32> to vector<32x32xf32>
    %200 = arith.addf %198, %199 : vector<32x32xf32>
    %cst_54 = arith.constant 0.000000e+00 : f32
    %201 = vector.broadcast %cst_54 : f32 to vector<32x32xf32>
    %202 = arith.cmpf ogt, %200, %201 : vector<32x32xf32>
    %cst_55 = arith.constant 2.000000e-01 : f32
    %203 = vector.broadcast %cst_55 : f32 to vector<32x32xf32>
    %204 = arith.mulf %203, %200 : vector<32x32xf32>
    %205 = arith.select %202, %200, %204 : vector<32x32xi1>, vector<32x32xf32>
    %cst_56 = arith.constant -1.000000e+30 : f32
    %206 = vector.broadcast %cst_56 : f32 to vector<32x32xf32>
    %207 = arith.select %3, %205, %206 : vector<32x32xi1>, vector<32x32xf32>
    %cst_57 = arith.constant dense<0xFF800000> : vector<32xf32>
    %208 = vector.multi_reduction <maximumf>, %207, %cst_57 [1] : vector<32x32xf32> to vector<32xf32>
    %209 = vector.shape_cast %208 : vector<32xf32> to vector<32x1xf32>
    %210 = vector.broadcast %209 : vector<32x1xf32> to vector<32x32xf32>
    %211 = arith.subf %207, %210 : vector<32x32xf32>
    %212 = math.exp %211 : vector<32x32xf32>
    %cst_58 = arith.constant dense<0.000000e+00> : vector<32xf32>
    %213 = vector.multi_reduction <add>, %212, %cst_58 [1] : vector<32x32xf32> to vector<32xf32>
    %214 = vector.shape_cast %213 : vector<32xf32> to vector<32x1xf32>
    %215 = tpu.reciprocal %214 {approx = true} : vector<32x1xf32> -> vector<32x1xf32>
    %216 = vector.broadcast %215 : vector<32x1xf32> to vector<32x32xf32>
    %217 = arith.mulf %212, %216 : vector<32x32xf32>
    %218 = arith.truncf %217 : vector<32x32xf32> to vector<32x32xbf16>
    %c16_i32_59 = arith.constant 16 : i32
    %219 = vector.broadcast %c16_i32_59 : i32 to vector<1x128xi32>
    %220 = arith.cmpi sge, %159, %219 : vector<1x128xi32>
    %c32_i32_60 = arith.constant 32 : i32
    %221 = vector.broadcast %c32_i32_60 : i32 to vector<1x128xi32>
    %222 = arith.cmpi slt, %159, %221 : vector<1x128xi32>
    %223 = arith.andi %220, %222 : vector<1x128xi1>
    %cst_61 = arith.constant 0.000000e+00 : f32
    %224 = vector.shape_cast %223 : vector<1x128xi1> to vector<1x128xi1>
    %225 = vector.broadcast %224 : vector<1x128xi1> to vector<32x128xi1>
    %226 = vector.broadcast %cst_61 : f32 to vector<32x128xf32>
    %227 = arith.select %225, %157, %226 : vector<32x128xi1>, vector<32x128xf32>
    %228 = arith.truncf %227 : vector<32x128xf32> to vector<32x128xbf16>
    %cst_62 = arith.constant dense<0.000000e+00> : vector<32x128xf32>
    %229 = tpu.matmul %218, %228, %cst_62 {dimension_numbers = #tpu.dot_dimension_numbers<[1], [0], [0], [1], [0, 0, 1, 1], [], []>} : vector<32x32xbf16>, vector<32x128xbf16>, vector<32x128xf32> -> vector<32x128xf32>
    %230 = arith.addf %195, %229 : vector<32x128xf32>
    %231 = vector.extract_strided_slice %157 {offsets = [0, 70], sizes = [32, 1], strides = [1, 1]} : vector<32x128xf32> to vector<32x1xf32>
    %232 = vector.extract_strided_slice %158 {offsets = [66, 0], sizes = [1, 32], strides = [1, 1]} : vector<128x32xf32> to vector<1x32xf32>
    %233 = vector.broadcast %231 : vector<32x1xf32> to vector<32x32xf32>
    %234 = vector.broadcast %232 : vector<1x32xf32> to vector<32x32xf32>
    %235 = arith.addf %233, %234 : vector<32x32xf32>
    %cst_63 = arith.constant 0.000000e+00 : f32
    %236 = vector.broadcast %cst_63 : f32 to vector<32x32xf32>
    %237 = arith.cmpf ogt, %235, %236 : vector<32x32xf32>
    %cst_64 = arith.constant 2.000000e-01 : f32
    %238 = vector.broadcast %cst_64 : f32 to vector<32x32xf32>
    %239 = arith.mulf %238, %235 : vector<32x32xf32>
    %240 = arith.select %237, %235, %239 : vector<32x32xi1>, vector<32x32xf32>
    %cst_65 = arith.constant -1.000000e+30 : f32
    %241 = vector.broadcast %cst_65 : f32 to vector<32x32xf32>
    %242 = arith.select %3, %240, %241 : vector<32x32xi1>, vector<32x32xf32>
    %cst_66 = arith.constant dense<0xFF800000> : vector<32xf32>
    %243 = vector.multi_reduction <maximumf>, %242, %cst_66 [1] : vector<32x32xf32> to vector<32xf32>
    %244 = vector.shape_cast %243 : vector<32xf32> to vector<32x1xf32>
    %245 = vector.broadcast %244 : vector<32x1xf32> to vector<32x32xf32>
    %246 = arith.subf %242, %245 : vector<32x32xf32>
    %247 = math.exp %246 : vector<32x32xf32>
    %cst_67 = arith.constant dense<0.000000e+00> : vector<32xf32>
    %248 = vector.multi_reduction <add>, %247, %cst_67 [1] : vector<32x32xf32> to vector<32xf32>
    %249 = vector.shape_cast %248 : vector<32xf32> to vector<32x1xf32>
    %250 = tpu.reciprocal %249 {approx = true} : vector<32x1xf32> -> vector<32x1xf32>
    %251 = vector.broadcast %250 : vector<32x1xf32> to vector<32x32xf32>
    %252 = arith.mulf %247, %251 : vector<32x32xf32>
    %253 = arith.truncf %252 : vector<32x32xf32> to vector<32x32xbf16>
    %c32_i32_68 = arith.constant 32 : i32
    %254 = vector.broadcast %c32_i32_68 : i32 to vector<1x128xi32>
    %255 = arith.cmpi sge, %159, %254 : vector<1x128xi32>
    %c48_i32_69 = arith.constant 48 : i32
    %256 = vector.broadcast %c48_i32_69 : i32 to vector<1x128xi32>
    %257 = arith.cmpi slt, %159, %256 : vector<1x128xi32>
    %258 = arith.andi %255, %257 : vector<1x128xi1>
    %cst_70 = arith.constant 0.000000e+00 : f32
    %259 = vector.shape_cast %258 : vector<1x128xi1> to vector<1x128xi1>
    %260 = vector.broadcast %259 : vector<1x128xi1> to vector<32x128xi1>
    %261 = vector.broadcast %cst_70 : f32 to vector<32x128xf32>
    %262 = arith.select %260, %157, %261 : vector<32x128xi1>, vector<32x128xf32>
    %263 = arith.truncf %262 : vector<32x128xf32> to vector<32x128xbf16>
    %cst_71 = arith.constant dense<0.000000e+00> : vector<32x128xf32>
    %264 = tpu.matmul %253, %263, %cst_71 {dimension_numbers = #tpu.dot_dimension_numbers<[1], [0], [0], [1], [0, 0, 1, 1], [], []>} : vector<32x32xbf16>, vector<32x128xbf16>, vector<32x128xf32> -> vector<32x128xf32>
    %265 = arith.addf %230, %264 : vector<32x128xf32>
    %266 = vector.extract_strided_slice %157 {offsets = [0, 71], sizes = [32, 1], strides = [1, 1]} : vector<32x128xf32> to vector<32x1xf32>
    %267 = vector.extract_strided_slice %158 {offsets = [67, 0], sizes = [1, 32], strides = [1, 1]} : vector<128x32xf32> to vector<1x32xf32>
    %268 = vector.broadcast %266 : vector<32x1xf32> to vector<32x32xf32>
    %269 = vector.broadcast %267 : vector<1x32xf32> to vector<32x32xf32>
    %270 = arith.addf %268, %269 : vector<32x32xf32>
    %cst_72 = arith.constant 0.000000e+00 : f32
    %271 = vector.broadcast %cst_72 : f32 to vector<32x32xf32>
    %272 = arith.cmpf ogt, %270, %271 : vector<32x32xf32>
    %cst_73 = arith.constant 2.000000e-01 : f32
    %273 = vector.broadcast %cst_73 : f32 to vector<32x32xf32>
    %274 = arith.mulf %273, %270 : vector<32x32xf32>
    %275 = arith.select %272, %270, %274 : vector<32x32xi1>, vector<32x32xf32>
    %cst_74 = arith.constant -1.000000e+30 : f32
    %276 = vector.broadcast %cst_74 : f32 to vector<32x32xf32>
    %277 = arith.select %3, %275, %276 : vector<32x32xi1>, vector<32x32xf32>
    %cst_75 = arith.constant dense<0xFF800000> : vector<32xf32>
    %278 = vector.multi_reduction <maximumf>, %277, %cst_75 [1] : vector<32x32xf32> to vector<32xf32>
    %279 = vector.shape_cast %278 : vector<32xf32> to vector<32x1xf32>
    %280 = vector.broadcast %279 : vector<32x1xf32> to vector<32x32xf32>
    %281 = arith.subf %277, %280 : vector<32x32xf32>
    %282 = math.exp %281 : vector<32x32xf32>
    %cst_76 = arith.constant dense<0.000000e+00> : vector<32xf32>
    %283 = vector.multi_reduction <add>, %282, %cst_76 [1] : vector<32x32xf32> to vector<32xf32>
    %284 = vector.shape_cast %283 : vector<32xf32> to vector<32x1xf32>
    %285 = tpu.reciprocal %284 {approx = true} : vector<32x1xf32> -> vector<32x1xf32>
    %286 = vector.broadcast %285 : vector<32x1xf32> to vector<32x32xf32>
    %287 = arith.mulf %282, %286 : vector<32x32xf32>
    %288 = arith.truncf %287 : vector<32x32xf32> to vector<32x32xbf16>
    %c48_i32_77 = arith.constant 48 : i32
    %289 = vector.broadcast %c48_i32_77 : i32 to vector<1x128xi32>
    %290 = arith.cmpi sge, %159, %289 : vector<1x128xi32>
    %c64_i32_78 = arith.constant 64 : i32
    %291 = vector.broadcast %c64_i32_78 : i32 to vector<1x128xi32>
    %292 = arith.cmpi slt, %159, %291 : vector<1x128xi32>
    %293 = arith.andi %290, %292 : vector<1x128xi1>
    %cst_79 = arith.constant 0.000000e+00 : f32
    %294 = vector.shape_cast %293 : vector<1x128xi1> to vector<1x128xi1>
    %295 = vector.broadcast %294 : vector<1x128xi1> to vector<32x128xi1>
    %296 = vector.broadcast %cst_79 : f32 to vector<32x128xf32>
    %297 = arith.select %295, %157, %296 : vector<32x128xi1>, vector<32x128xf32>
    %298 = arith.truncf %297 : vector<32x128xf32> to vector<32x128xbf16>
    %cst_80 = arith.constant dense<0.000000e+00> : vector<32x128xf32>
    %299 = tpu.matmul %288, %298, %cst_80 {dimension_numbers = #tpu.dot_dimension_numbers<[1], [0], [0], [1], [0, 0, 1, 1], [], []>} : vector<32x32xbf16>, vector<32x128xbf16>, vector<32x128xf32> -> vector<32x128xf32>
    %300 = arith.addf %265, %299 : vector<32x128xf32>
    %c0_81 = arith.constant 0 : index
    %c0_82 = arith.constant 0 : index
    %301 = vector.load %arg5[%c0_81, %c0_82] : memref<1x128xf32, #tpu.memory_space<vmem>>, vector<1x128xf32>
    %302 = vector.broadcast %301 : vector<1x128xf32> to vector<32x128xf32>
    %303 = arith.addf %300, %302 : vector<32x128xf32>
    %cst_83 = arith.constant 0.000000e+00 : f32
    %304 = vector.broadcast %cst_83 : f32 to vector<32x128xf32>
    %305 = arith.maximumf %303, %304 : vector<32x128xf32>
    %306 = arith.truncf %305 : vector<32x128xf32> to vector<32x128xbf16>
    %c0_84 = arith.constant 0 : index
    %c0_85 = arith.constant 0 : index
    %307 = vector.load %arg6[%c0_84, %c0_85] : memref<128x128xbf16, #tpu.memory_space<vmem>>, vector<128x128xbf16>
    %cst_86 = arith.constant dense<0.000000e+00> : vector<32x128xf32>
    %308 = tpu.matmul %306, %307, %cst_86 {dimension_numbers = #tpu.dot_dimension_numbers<[1], [0], [0], [1], [0, 0, 1, 1], [], []>} : vector<32x128xbf16>, vector<128x128xbf16>, vector<32x128xf32> -> vector<32x128xf32>
    %309 = tpu.transpose %308, [1, 0] : vector<32x128xf32> -> vector<128x32xf32>
    %310 = tpu.iota {dimensions = array<i32: 1>} : vector<1x128xi32>
    %cst_87 = arith.constant 0.000000e+00 : f32
    %311 = vector.broadcast %cst_87 : f32 to vector<32x128xf32>
    %312 = vector.extract_strided_slice %308 {offsets = [0, 18], sizes = [32, 1], strides = [1, 1]} : vector<32x128xf32> to vector<32x1xf32>
    %313 = vector.extract_strided_slice %309 {offsets = [16, 0], sizes = [1, 32], strides = [1, 1]} : vector<128x32xf32> to vector<1x32xf32>
    %314 = vector.broadcast %312 : vector<32x1xf32> to vector<32x32xf32>
    %315 = vector.broadcast %313 : vector<1x32xf32> to vector<32x32xf32>
    %316 = arith.addf %314, %315 : vector<32x32xf32>
    %cst_88 = arith.constant 0.000000e+00 : f32
    %317 = vector.broadcast %cst_88 : f32 to vector<32x32xf32>
    %318 = arith.cmpf ogt, %316, %317 : vector<32x32xf32>
    %cst_89 = arith.constant 2.000000e-01 : f32
    %319 = vector.broadcast %cst_89 : f32 to vector<32x32xf32>
    %320 = arith.mulf %319, %316 : vector<32x32xf32>
    %321 = arith.select %318, %316, %320 : vector<32x32xi1>, vector<32x32xf32>
    %cst_90 = arith.constant -1.000000e+30 : f32
    %322 = vector.broadcast %cst_90 : f32 to vector<32x32xf32>
    %323 = arith.select %3, %321, %322 : vector<32x32xi1>, vector<32x32xf32>
    %cst_91 = arith.constant dense<0xFF800000> : vector<32xf32>
    %324 = vector.multi_reduction <maximumf>, %323, %cst_91 [1] : vector<32x32xf32> to vector<32xf32>
    %325 = vector.shape_cast %324 : vector<32xf32> to vector<32x1xf32>
    %326 = vector.broadcast %325 : vector<32x1xf32> to vector<32x32xf32>
    %327 = arith.subf %323, %326 : vector<32x32xf32>
    %328 = math.exp %327 : vector<32x32xf32>
    %cst_92 = arith.constant dense<0.000000e+00> : vector<32xf32>
    %329 = vector.multi_reduction <add>, %328, %cst_92 [1] : vector<32x32xf32> to vector<32xf32>
    %330 = vector.shape_cast %329 : vector<32xf32> to vector<32x1xf32>
    %331 = tpu.reciprocal %330 {approx = true} : vector<32x1xf32> -> vector<32x1xf32>
    %332 = vector.broadcast %331 : vector<32x1xf32> to vector<32x32xf32>
    %333 = arith.mulf %328, %332 : vector<32x32xf32>
    %334 = arith.truncf %333 : vector<32x32xf32> to vector<32x32xbf16>
    %c0_i32_93 = arith.constant 0 : i32
    %335 = vector.broadcast %c0_i32_93 : i32 to vector<1x128xi32>
    %336 = arith.cmpi sge, %310, %335 : vector<1x128xi32>
    %c8_i32 = arith.constant 8 : i32
    %337 = vector.broadcast %c8_i32 : i32 to vector<1x128xi32>
    %338 = arith.cmpi slt, %310, %337 : vector<1x128xi32>
    %339 = arith.andi %336, %338 : vector<1x128xi1>
    %cst_94 = arith.constant 0.000000e+00 : f32
    %340 = vector.shape_cast %339 : vector<1x128xi1> to vector<1x128xi1>
    %341 = vector.broadcast %340 : vector<1x128xi1> to vector<32x128xi1>
    %342 = vector.broadcast %cst_94 : f32 to vector<32x128xf32>
    %343 = arith.select %341, %308, %342 : vector<32x128xi1>, vector<32x128xf32>
    %344 = arith.truncf %343 : vector<32x128xf32> to vector<32x128xbf16>
    %cst_95 = arith.constant dense<0.000000e+00> : vector<32x128xf32>
    %345 = tpu.matmul %334, %344, %cst_95 {dimension_numbers = #tpu.dot_dimension_numbers<[1], [0], [0], [1], [0, 0, 1, 1], [], []>} : vector<32x32xbf16>, vector<32x128xbf16>, vector<32x128xf32> -> vector<32x128xf32>
    %346 = arith.addf %311, %345 : vector<32x128xf32>
    %347 = vector.extract_strided_slice %308 {offsets = [0, 19], sizes = [32, 1], strides = [1, 1]} : vector<32x128xf32> to vector<32x1xf32>
    %348 = vector.extract_strided_slice %309 {offsets = [17, 0], sizes = [1, 32], strides = [1, 1]} : vector<128x32xf32> to vector<1x32xf32>
    %349 = vector.broadcast %347 : vector<32x1xf32> to vector<32x32xf32>
    %350 = vector.broadcast %348 : vector<1x32xf32> to vector<32x32xf32>
    %351 = arith.addf %349, %350 : vector<32x32xf32>
    %cst_96 = arith.constant 0.000000e+00 : f32
    %352 = vector.broadcast %cst_96 : f32 to vector<32x32xf32>
    %353 = arith.cmpf ogt, %351, %352 : vector<32x32xf32>
    %cst_97 = arith.constant 2.000000e-01 : f32
    %354 = vector.broadcast %cst_97 : f32 to vector<32x32xf32>
    %355 = arith.mulf %354, %351 : vector<32x32xf32>
    %356 = arith.select %353, %351, %355 : vector<32x32xi1>, vector<32x32xf32>
    %cst_98 = arith.constant -1.000000e+30 : f32
    %357 = vector.broadcast %cst_98 : f32 to vector<32x32xf32>
    %358 = arith.select %3, %356, %357 : vector<32x32xi1>, vector<32x32xf32>
    %cst_99 = arith.constant dense<0xFF800000> : vector<32xf32>
    %359 = vector.multi_reduction <maximumf>, %358, %cst_99 [1] : vector<32x32xf32> to vector<32xf32>
    %360 = vector.shape_cast %359 : vector<32xf32> to vector<32x1xf32>
    %361 = vector.broadcast %360 : vector<32x1xf32> to vector<32x32xf32>
    %362 = arith.subf %358, %361 : vector<32x32xf32>
    %363 = math.exp %362 : vector<32x32xf32>
    %cst_100 = arith.constant dense<0.000000e+00> : vector<32xf32>
    %364 = vector.multi_reduction <add>, %363, %cst_100 [1] : vector<32x32xf32> to vector<32xf32>
    %365 = vector.shape_cast %364 : vector<32xf32> to vector<32x1xf32>
    %366 = tpu.reciprocal %365 {approx = true} : vector<32x1xf32> -> vector<32x1xf32>
    %367 = vector.broadcast %366 : vector<32x1xf32> to vector<32x32xf32>
    %368 = arith.mulf %363, %367 : vector<32x32xf32>
    %369 = arith.truncf %368 : vector<32x32xf32> to vector<32x32xbf16>
    %c8_i32_101 = arith.constant 8 : i32
    %370 = vector.broadcast %c8_i32_101 : i32 to vector<1x128xi32>
    %371 = arith.cmpi sge, %310, %370 : vector<1x128xi32>
    %c16_i32_102 = arith.constant 16 : i32
    %372 = vector.broadcast %c16_i32_102 : i32 to vector<1x128xi32>
    %373 = arith.cmpi slt, %310, %372 : vector<1x128xi32>
    %374 = arith.andi %371, %373 : vector<1x128xi1>
    %cst_103 = arith.constant 0.000000e+00 : f32
    %375 = vector.shape_cast %374 : vector<1x128xi1> to vector<1x128xi1>
    %376 = vector.broadcast %375 : vector<1x128xi1> to vector<32x128xi1>
    %377 = vector.broadcast %cst_103 : f32 to vector<32x128xf32>
    %378 = arith.select %376, %308, %377 : vector<32x128xi1>, vector<32x128xf32>
    %379 = arith.truncf %378 : vector<32x128xf32> to vector<32x128xbf16>
    %cst_104 = arith.constant dense<0.000000e+00> : vector<32x128xf32>
    %380 = tpu.matmul %369, %379, %cst_104 {dimension_numbers = #tpu.dot_dimension_numbers<[1], [0], [0], [1], [0, 0, 1, 1], [], []>} : vector<32x32xbf16>, vector<32x128xbf16>, vector<32x128xf32> -> vector<32x128xf32>
    %381 = arith.addf %346, %380 : vector<32x128xf32>
    %382 = vector.extract_strided_slice %381 {offsets = [0, 0], sizes = [32, 8], strides = [1, 1]} : vector<32x128xf32> to vector<32x8xf32>
    %383 = vector.extract_strided_slice %381 {offsets = [0, 8], sizes = [32, 8], strides = [1, 1]} : vector<32x128xf32> to vector<32x8xf32>
    %384 = arith.addf %382, %383 : vector<32x8xf32>
    %cst_105 = arith.constant 5.000000e-01 : f32
    %385 = vector.broadcast %cst_105 : f32 to vector<32x8xf32>
    %386 = arith.mulf %384, %385 : vector<32x8xf32>
    %cst_106 = arith.constant 0.000000e+00 : f32
    %387 = vector.broadcast %cst_106 : f32 to vector<32x120xf32>
    %388 = tpu.concatenate %386, %387 in 1 : vector<32x8xf32>, vector<32x120xf32> -> vector<32x128xf32>
    %c0_107 = arith.constant 0 : index
    %c0_108 = arith.constant 0 : index
    %389 = vector.load %arg7[%c0_107, %c0_108] : memref<1x128xf32, #tpu.memory_space<vmem>>, vector<1x128xf32>
    %390 = vector.broadcast %389 : vector<1x128xf32> to vector<32x128xf32>
    %391 = arith.addf %388, %390 : vector<32x128xf32>
    %392 = tpu.iota {dimensions = array<i32: 1>} : vector<1x128xi32>
    %c8_i32_109 = arith.constant 8 : i32
    %393 = vector.broadcast %c8_i32_109 : i32 to vector<1x128xi32>
    %394 = arith.cmpi slt, %392, %393 : vector<1x128xi32>
    %cst_110 = arith.constant -1.000000e+30 : f32
    %395 = vector.shape_cast %394 : vector<1x128xi1> to vector<1x128xi1>
    %396 = vector.broadcast %395 : vector<1x128xi1> to vector<32x128xi1>
    %397 = vector.broadcast %cst_110 : f32 to vector<32x128xf32>
    %398 = arith.select %396, %391, %397 : vector<32x128xi1>, vector<32x128xf32>
    %cst_111 = arith.constant dense<0xFF800000> : vector<32xf32>
    %399 = vector.multi_reduction <maximumf>, %398, %cst_111 [1] : vector<32x128xf32> to vector<32xf32>
    %400 = vector.shape_cast %399 : vector<32xf32> to vector<32x1xf32>
    %401 = vector.broadcast %400 : vector<32x1xf32> to vector<32x128xf32>
    %402 = arith.subf %391, %401 : vector<32x128xf32>
    %403 = math.exp %402 : vector<32x128xf32>
    %cst_112 = arith.constant 0.000000e+00 : f32
    %404 = vector.shape_cast %394 : vector<1x128xi1> to vector<1x128xi1>
    %405 = vector.broadcast %404 : vector<1x128xi1> to vector<32x128xi1>
    %406 = vector.broadcast %cst_112 : f32 to vector<32x128xf32>
    %407 = arith.select %405, %403, %406 : vector<32x128xi1>, vector<32x128xf32>
    %cst_113 = arith.constant dense<0.000000e+00> : vector<32xf32>
    %408 = vector.multi_reduction <add>, %407, %cst_113 [1] : vector<32x128xf32> to vector<32xf32>
    %409 = vector.shape_cast %408 : vector<32xf32> to vector<32x1xf32>
    %410 = math.log %409 : vector<32x1xf32>
    %411 = arith.addf %410, %400 : vector<32x1xf32>
    %412 = vector.broadcast %411 : vector<32x1xf32> to vector<32x128xf32>
    %413 = arith.subf %391, %412 : vector<32x128xf32>
    %c0_114 = arith.constant 0 : index
    %c0_115 = arith.constant 0 : index
    %414 = vector.load %arg8[%c0_114, %c0_115] : memref<32x128xf32, #tpu.memory_space<vmem>>, vector<32x128xf32>
    tpu.vector_store %arg8[%c0_114, %c0_115], %413 {strides = array<i32>} : memref<32x128xf32, #tpu.memory_space<vmem>>, vector<32x128xf32>,
    return
  }
}

</mosaic_0001>

<bundles_post_ra>
// kernel: tpu_custom_call.1
= control target key start
LH: loop header
LB: loop body
LE: loop exit
PB: predicated region body
PF: predicated region fallthrough
CT: control target
= control target key end

     0   :  { %13 = vsyncpa [#allocation3], 0  ;;  %s3821_s0 = inlined_call_operand.hbm [shape: bf16[32,128], index: 0, kind: input, shape index: {}]   ;;  %s3822_s1 = inlined_call_operand.hbm [shape: s8[32,32], index: 1, kind: input, shape index: {}]   ;;  %s3823_s2 = inlined_call_operand.hbm [shape: bf16[128,128], index: 2, kind: input, shape index: {}]   ;;  %s3824_s3 = inlined_call_operand.vmem [shape: f32[1,128], index: 3, kind: input, shape index: {}]   ;;  %s3825_s4 = inlined_call_operand.hbm [shape: bf16[128,128], index: 4, kind: input, shape index: {}]   ;;  %s3826_s5 = inlined_call_operand.vmem [shape: f32[1,128], index: 5, kind: input, shape index: {}]   ;;  %s3827_s6 = inlined_call_operand.hbm [shape: bf16[128,128], index: 6, kind: input, shape index: {}]   ;;  %s3828_s7 = inlined_call_operand.vmem [shape: f32[1,128], index: 7, kind: input, shape index: {}]   ;;  %s3829_s8 = inlined_call_operand.hbm [shape: f32[32,128], index: 8, kind: output, shape index: {}]  }
   0x1   :  { %14 = vsyncpa [#allocation6], 0 }
   0x2   :  { %15 = vsyncpa [#allocation9], 0 }
   0x3   :  { %16 = vsyncpa [#allocation4], 0  ;;  %s2944_s27 = smov [#allocation5]  }
   0x4   :  { %s35_s28 = sshll.u32 %s2944_s27, 4  ;;  %s36_s28 = int_to_ptr.vmem [resolvable:$true] %s35_s28 }
   0x5   :  { %s2824_s29 = scalar_lea.vmem %s36_s28, 128  ;;  %p2829_p1 = scmp.lt.s32.totalorder %s36_s28, %s36_s28 }
   0x6   :  { %p2825_p0 = scmp.ne.s32.totalorder %s36_s28, %s2824_s29  ;;  %p2830_p2 = scmp.lt.s32.totalorder %s2824_s29, %s2824_s29 }
   0x8   :  { %p2831_p3 = por %p2830_p2, %p2829_p1 }
   0xa   :  { %p2832_p4 = pnand %p2831_p3, %p2825_p0 }
   0xc   :  { %2835 = shalt.err (!%p2832_p4)
}
   0xd   :  { %38 = dma.hbm_to_vmem [thread:$0]  %s3822_s1, 128, %s36_s28, [#allocation6]  }
   0xe   :  { %s2945_s10 = smov [#allocation8]   ;;  %s2946_s12 = smov [#allocation2]  }
   0xf   :  { %s58_s11 = sshll.u32 %s2945_s10, 4  ;;  %s22_s13 = sshll.u32 %s2946_s12, 4  ;;  %s59_s11 = int_to_ptr.vmem [resolvable:$true] %s58_s11  ;;  %s23_s13 = int_to_ptr.vmem [resolvable:$true] %s22_s13 }
  0x10   :  { %s2844_s14 = scalar_lea.vmem %s59_s11, 1024  ;;  %p2849_p6 = scmp.lt.s32.totalorder %s59_s11, %s59_s11 }
  0x11   :  { %p2845_p5 = scmp.ne.s32.totalorder %s59_s11, %s2844_s14  ;;  %p2850_p7 = scmp.lt.s32.totalorder %s2844_s14, %s2844_s14 }
  0x13   :  { %p2851_p8 = por %p2850_p7, %p2849_p6 }
  0x15   :  { %p2852_p9 = pnand %p2851_p8, %p2845_p5 }
  0x17   :  { %2855 = shalt.err (!%p2852_p9)
}
  0x18   :  { %s2947_s15 = smov 64   ;;  %s2948_s16 = smov 4  }
  0x19   :  { %64 = dma.hbm_to_vmem [thread:$0]  %s3825_s4, 1024, %s59_s11, [#allocation9], %s2947_s15, %s2947_s15, %s2948_s16  }
  0x1a   :  { %s2864_s1 = scalar_lea.vmem %s23_s13, 256  ;;  %p2869_p11 = scmp.lt.s32.totalorder %s23_s13, %s23_s13 }
  0x1b   :  { %p2865_p10 = scmp.ne.s32.totalorder %s23_s13, %s2864_s1  ;;  %p2870_p12 = scmp.lt.s32.totalorder %s2864_s1, %s2864_s1 }
  0x1d   :  { %p2871_p13 = por %p2870_p12, %p2869_p11 }
  0x1f   :  { %p2872_p0 = pnand %p2871_p13, %p2865_p10 }
  0x21   :  { %2875 = shalt.err (!%p2872_p0)
}
  0x22   :  { %28 = dma.hbm_to_vmem [thread:$0]  %s3821_s0, 256, %s23_s13, [#allocation3], %s2947_s15, %s2947_s15, %s2948_s16  }
  0x23   :  { %s2949_s21 = smov [#allocation7]   ;;  %s2950_s23 = smov [#allocation10]  }
  0x24   :  { %s44_s22 = sshll.u32 %s2949_s21, 4  ;;  %s72_s4 = sshll.u32 %s2950_s23, 4  ;;  %s45_s22 = int_to_ptr.vmem [resolvable:$true] %s44_s22  ;;  %s73_s4 = int_to_ptr.vmem [resolvable:$true] %s72_s4 }
  0x25   :  { %s2884_s24 = scalar_lea.vmem %s45_s22, 1024  ;;  %p2889_p2 = scmp.lt.s32.totalorder %s45_s22, %s45_s22 }
  0x26   :  { %p2885_p1 = scmp.ne.s32.totalorder %s45_s22, %s2884_s24  ;;  %p2890_p3 = scmp.lt.s32.totalorder %s2884_s24, %s2884_s24 }
  0x28   :  { %p2891_p4 = por %p2890_p3, %p2889_p2 }
  0x2a   :  { %p2892_p5 = pnand %p2891_p4, %p2885_p1 }
  0x2c   :  { %2895 = shalt.err (!%p2892_p5)
}
  0x2d   :  { %50 = dma.hbm_to_vmem [thread:$0]  %s3823_s2, 1024, %s45_s22, [#allocation6], %s2947_s15, %s2947_s15, %s2948_s16  }
  0x2e   :  { %s2904_s0 = scalar_lea.vmem %s73_s4, 1024  ;;  %p2909_p7 = scmp.lt.s32.totalorder %s73_s4, %s73_s4 }
  0x2f   :  { %p2905_p6 = scmp.ne.s32.totalorder %s73_s4, %s2904_s0  ;;  %p2910_p8 = scmp.lt.s32.totalorder %s2904_s0, %s2904_s0 }
  0x31   :  { %p2911_p9 = por %p2910_p8, %p2909_p7 }
  0x33   :  { %p2912_p10 = pnand %p2911_p9, %p2905_p6 }
  0x35   :  { %2915 = shalt.err (!%p2912_p10)
}
  0x36   :  { %78 = dma.hbm_to_vmem [thread:$0]  %s3827_s6, 1024, %s73_s4, [#allocation9], %s2947_s15, %s2947_s15, %s2948_s16  }
  0x37   :  { %2936 = dma.done.wait [#allocation3], 256  }
  0x38   :  { %2937 = vsyncadd [#allocation3], 4294967040 }
  0x39   :  { %2938 = dma.done.wait [#allocation6], 1152  }
  0x3a   :  { %2939 = vsyncadd [#allocation6], 4294966144 }
  0x3b   :  { %2940 = dma.done.wait [#allocation9], 2048  }
  0x3c   :  { %2941 = vsyncadd [#allocation9], 4294965248  ;;  %v2951_v0 = vmov 70   ;;  %v2952_v1 = vmov 69   ;;  %v2614_v2 = vld [vmem:[#allocation7 + $0x38] sm:$0xff]   ;;  %v2615_v3 = vld [vmem:[#allocation7 + $0x30] sm:$0xff]   ;;  %v271_v12 = vlaneseq }
  0x3d   :  { %2580 = vset.pattern.permute.xlu0 %v2951_v0  ;;  %2578 = vset.pattern.permute.xlu1 %v2952_v1  ;;  %v2616_v4 = vld [vmem:[#allocation7 + $0x28] sm:$0xff]   ;;  %v2617_v5 = vld [vmem:[#allocation7 + $0x20] sm:$0xff]   ;;  %v2618_v7 = vld [vmem:[#allocation7 + $0x18] sm:$0xff]   ;;  %v2953_v19 = vmov 71   ;;  %v2954_v20 = vmov 68   ;;  %vm317_vm7 = vcmask 261120  }
  0x3e   :  { %2420 = vmatprep.subr.bf16.mxu0 %v2614_v2  ;;  %v2622_v6 = vld [vmem:[#allocation2] sm:$0xff]   ;;  %v2619_v8 = vld [vmem:[#allocation7 + $0x10] sm:$0xff]   ;;  %v2621_v10 = vld [vmem:[#allocation7] sm:$0xff]   ;;  %v3036_v13 = vand.u32 127, %v271_v12  ;;  %v3100_v44 = vshrl.u32 %v271_v12, 7 }
  0x3f   :  { %2421 = vmatpush3.bf16.msra.mxu0 %v2614_v2  ;;  %2436 = vmatprep.mubr.bf16.mxu0 %v2622_v6  ;;  %v2620_v9 = vld [vmem:[#allocation7 + $0x8] sm:$0xff]   ;;  %v2623_v11 = vld [vmem:[#allocation2 + $0x8] sm:$0xff]   ;;  %v97_v42 = vld [vmem:[#allocation5] sm:$0xff] }
  0x40   :  { %2422 = vmatprep.subr.bf16.mxu0 %v2615_v3  ;;  %vm461_vm0 = vcmp.ge.s32.totalorder %v3036_v13, 16  ;;  %vm462_vm1 = vcmp.lt.s32.totalorder %v3036_v13, 32  ;;  %vm365_vm4 = vcmp.lt.s32.totalorder %v3036_v13, 16  ;;  %v99_v45 = vunpack.c.1.s8 %v97_v42 }
  0x41   :  { %vm463_vm2 = vmand %vm461_vm0, %vm462_vm1  ;;  %v98_v46 = vunpack.c.0.s8 %v97_v42  ;;  %v100_v47 = vunpack.c.2.s8 %v97_v42  ;;  %v3105_v50 = vsub.s32 0, %v3100_v44  ;;  %v3108_v51 = vsub.s32 1, %v3100_v44 }
  0x42   :  { %vm3040_vm3 = vmpackc.low %vm463_vm2, %vm463_vm2  ;;  %v756_v52 = vsub.s32 3, %v3100_v44  ;;  %v3111_v53 = vcvt.s32.f32 %v99_v45  ;;  %v101_v57 = vunpack.c.3.s8 %v97_v42 }
  0x43   :  { %2423 = vmatpush3.bf16.msra.mxu0 %v2615_v3  ;;  %vm3065_vm5 = vmpackc.low %vm365_vm4, %vm365_vm4  ;;  %v3113_v54 = vcvt.s32.f32 %v98_v46  ;;  %v3115_v55 = vcvt.s32.f32 %v100_v47 }
  0x44   :  { %2424 = vmatprep.subr.bf16.mxu0 %v2616_v4  ;;  %vm107_vm6 = vcmp.gt.f32.partialorder %v3111_v53, 0.0 }
  0x45   :  { %vm106_vm8 = vcmp.gt.f32.partialorder %v3113_v54, 0.0  ;;  %vm108_vm9 = vcmp.gt.f32.partialorder %v3115_v55, 0.0 }
  0x47   :  { %2425 = vmatpush3.bf16.msra.mxu0 %v2616_v4 }
  0x48   :  { %2426 = vmatprep.subr.bf16.mxu0 %v2617_v5 }
  0x4b   :  { %2427 = vmatpush3.bf16.msra.mxu0 %v2617_v5  ;;  %v3130_v5 = vcvt.s32.f32 %v101_v57 }
  0x4c   :  { %2428 = vmatprep.subr.bf16.mxu0 %v2618_v7 }
  0x4d   :  { %vm109_vm0 = vcmp.gt.f32.partialorder %v3130_v5, 0.0 }
  0x4f   :  { %2429 = vmatpush3.bf16.msra.mxu0 %v2618_v7 }
  0x50   :  { %2430 = vmatprep.subr.bf16.mxu0 %v2619_v8 }
  0x53   :  { %2431 = vmatpush3.bf16.msra.mxu0 %v2619_v8 }
  0x54   :  { %2432 = vmatprep.subr.bf16.mxu0 %v2620_v9 }
  0x57   :  { %2433 = vmatpush3.bf16.msra.mxu0 %v2620_v9 }
  0x58   :  { %2434 = vmatprep.subr.bf16.mxu0 %v2621_v10 }
  0x5b   :  { %2435 = vmatpush3.bf16.msra.mxu0 %v2621_v10 }
  0x5e   :  { %2437 = vmatmul.mubr.bf16.vlgmr.msra.gmra.mxu0 %v2623_v11 }
 0x11e   :  { %v2438_v14 = vpop.f32.mrf.mxu0 }
 0x11f   :  { %591 = vperm.xlu0 %2580, %v2438_v14   ;;  %384 = vperm.xlu1 %2578, %v2438_v14  }
 0x120   :  { %v224_v15 = vpop.f32.mrf.mxu0 }
 0x122   :  { %v2439_v16 = vpop.f32.mrf.mxu0 }
 0x123   :  { %v3044_v18 = vpack.c.bf16 %v2439_v16, %v2438_v14  ;;  %2581 = vset.pattern.permute.xlu0 %v2953_v19  ;;  %2579 = vset.pattern.permute.xlu1 %v2954_v20 }
 0x124   :  { %747 = vperm.xlu0 %2581, %v2438_v14   ;;  %285 = vperm.xlu1 %2579, %v2438_v14   ;;  %v227_v21 = vpop.f32.mrf.mxu0 }
 0x125   :  { %v3048_v22 = vpack.c.bf16 %v227_v21, %v224_v15  ;;  %2440 = vmatprep.subr.msk.bf16.mxu1 %vm3040_vm3, %v3044_v18 }
 0x126   :  { %2441 = vmatpush3.bf16.msk.msra.mxu1 %vm3040_vm3, %v3044_v18 }
 0x127   :  { %2442 = vmatprep.subr.msk.bf16.mxu1 %vm3040_vm3, %v3048_v22 }
 0x128   :  { %2582 = vset.pattern.permute.xlu0 %v2952_v1  ;;  %2586 = vset.pattern.permute.xlu1 %v2952_v1 }
 0x129   :  { %376 = vperm.xlu0 %2582, %v224_v15   ;;  %388 = vperm.xlu1 %2586, %v2439_v16  }
 0x12a   :  { %2443 = vmatpush3.bf16.msk.msra.mxu1 %vm3040_vm3, %v3048_v22 }
 0x12b   :  { %2448 = vmatprep.subr.msk.bf16.mxu1 %vm3065_vm5, %v3044_v18 }
 0x12d   :  { %2583 = vset.pattern.permute.xlu0 %v2954_v20  ;;  %2591 = vset.pattern.permute.xlu1 %v2954_v20 }
 0x12e   :  { %275 = vperm.xlu0 %2583, %v224_v15   ;;  %280 = vperm.xlu1 %2591, %v227_v21  }
 0x132   :  { %2584 = vset.pattern.permute.xlu0 %v2951_v0 }
 0x133   :  { %583 = vperm.xlu0 %2584, %v224_v15  }
 0x137   :  { %2585 = vset.pattern.permute.xlu0 %v2953_v19 }
 0x138   :  { %739 = vperm.xlu0 %2585, %v224_v15  }
 0x13c   :  { %2587 = vset.pattern.permute.xlu0 %v2954_v20 }
 0x13d   :  { %290 = vperm.xlu0 %2587, %v2439_v16  }
 0x141   :  { %2588 = vset.pattern.permute.xlu0 %v2951_v0 }
 0x142   :  { %595 = vperm.xlu0 %2588, %v2439_v16  }
 0x146   :  { %2589 = vset.pattern.permute.xlu0 %v2953_v19 }
 0x147   :  { %751 = vperm.xlu0 %2589, %v2439_v16  }
 0x14b   :  { %2590 = vset.pattern.permute.xlu0 %v2952_v1 }
 0x14c   :  { %380 = vperm.xlu0 %2590, %v227_v21  }
 0x150   :  { %2592 = vset.pattern.permute.xlu0 %v2951_v0 }
 0x151   :  { %587 = vperm.xlu0 %2592, %v227_v21  }
 0x155   :  { %2593 = vset.pattern.permute.xlu0 %v2953_v19 }
 0x156   :  { %743 = vperm.xlu0 %2593, %v227_v21  }
 0x157   :  { %239 = vxpose.xlu1.b32.start [1/4] (short) (narrow) %v224_v15, 72 }
 0x15a   :  { %2596 = vset.pattern.permute.xlu0 %v2951_v0 }
 0x15b   :  { %240 = vxpose.xlu1.b32.cont [2/4] (short) (narrow) %v227_v21, 72 }
 0x15f   :  { %241 = vxpose.xlu1.b32.cont [3/4] (short) (narrow) %v2438_v14, 72 }
 0x163   :  { %242 = vxpose.xlu1.b32.end [4/4] (short) (narrow) %v2439_v16, 72 }
 0x181   :  { %2594 = vset.pattern.permute.xlu1 %v2952_v1 }
 0x19a   :  { %v385_v24 = vpop.permute.xlu1 %384  ;;  %v3087_v25 = vpop.permute.xlu0 %591 }
 0x19f   :  { %v3089_v26 = vpop.permute.xlu1 %285  ;;  %v748_v27 = vpop.permute.xlu0 %747 }
 0x1a4   :  { %v389_v28 = vpop.permute.xlu1 %388  ;;  %v377_v29 = vpop.permute.xlu0 %376 }
 0x1a9   :  { %v3091_v30 = vpop.permute.xlu1 %280  ;;  %v276_v31 = vpop.permute.xlu0 %275 }
 0x1ae   :  { %v3093_v33 = vpop.permute.xlu0 %583 }
 0x1b3   :  { %v740_v36 = vpop.permute.xlu0 %739 }
 0x1b8   :  { %v3095_v38 = vpop.permute.xlu0 %290 }
 0x1bd   :  { %v3097_v41 = vpop.permute.xlu0 %595 }
 0x1c2   :  { %v3102_v48 = vpop.permute.xlu0 %751 }
 0x1c7   :  { %v381_v61 = vpop.permute.xlu0 %380 }
 0x1d3   :  { %v255_v32 = vpop.trf.xlu1 }
 0x1d7   :  { %v256_v34 = vpop.trf.xlu1 }
 0x1db   :  { %v257_v35 = vpop.trf.xlu1 }
 0x1df   :  { %v258_v37 = vpop.trf.xlu1 }
 0x1e3   :  { %v259_v39 = vpop.trf.xlu1 }
 0x1e7   :  { %v260_v40 = vpop.trf.xlu1 }
 0x1eb   :  { %v261_v43 = vpop.trf.xlu1 }
 0x1ef   :  { %v262_v49 = vpop.trf.xlu1 }
 0x1f3   :  { %v263_v56 = vpop.trf.xlu1 }
 0x1f4   :  { %v3118_v58 = vrot.slane %v263_v56, %v3105_v50  ;;  %v394_v59 = vrot.slane %v263_v56, %v3108_v51  ;;  %v3123_v60 = vrot.slane %v263_v56, %v756_v52 }
 0x1f6   :  { %v396_v62 = vadd.f32 %v394_v59, %v381_v61  ;;  %v395_v63 = vadd.f32 %v394_v59, %v377_v29  ;;  %v758_v2 = vadd.f32 %v3123_v60, %v740_v36  ;;  %v397_v3 = vadd.f32 %v394_v59, %v385_v24 }
 0x1f7   :  { %v760_v4 = vadd.f32 %v3123_v60, %v748_v27  ;;  %v398_v6 = vadd.f32 %v394_v59, %v389_v28  ;;  %v297_v7 = vadd.f32 %v3118_v58, %v276_v31  ;;  %v600_v31 = vsub.s32 2, %v3100_v44 }
 0x1f8   :  { %vm400_vm10 = vcmp.gt.f32.partialorder %v396_v62, 0.0  ;;  %v404_v8 = vmul.f32 0.2, %v396_v62  ;;  %vm399_vm11 = vcmp.gt.f32.partialorder %v395_v63, 0.0  ;;  %v403_v9 = vmul.f32 0.2, %v395_v63 }
 0x1f9   :  { %vm762_vm12 = vcmp.gt.f32.partialorder %v758_v2, 0.0  ;;  %v766_v10 = vmul.f32 0.2, %v758_v2  ;;  %vm401_vm13 = vcmp.gt.f32.partialorder %v397_v3, 0.0  ;;  %v405_v11 = vmul.f32 0.2, %v397_v3 }
 0x1fa   :  { %v408_v12 = vsel %vm400_vm10, %v396_v62, %v404_v8  ;;  %v407_v14 = vsel %vm399_vm11, %v395_v63, %v403_v9  ;;  %vm764_vm14 = vcmp.gt.f32.partialorder %v760_v4, 0.0  ;;  %v768_v15 = vmul.f32 0.2, %v760_v4 }
 0x1fb   :  { %v3135_v16 = vsel %vm107_vm6, %v408_v12, -1e+30  ;;  %v3139_v21 = vsel %vm106_vm8, %v407_v14, -1e+30  ;;  %v770_v24 = vsel %vm762_vm12, %v758_v2, %v766_v10  ;;  %v409_v27 = vsel %vm401_vm13, %v397_v3, %v405_v11  ;;  %v588_v14 = vpop.permute.xlu0 %587 }
 0x1fc   :  { %v418_v28 = vsel %vm317_vm7, %v3135_v16, -inf  ;;  %v415_v29 = vsel %vm317_vm7, %v3139_v21, -inf  ;;  %v3148_v32 = vsel %vm106_vm8, %v770_v24, -1e+30  ;;  %v3152_v34 = vsel %vm108_vm9, %v409_v27, -1e+30 }
 0x1fd   :  { %419 = vmax.xlane.f32.xlu1 %v418_v28  ;;  %416 = vmax.xlane.f32.xlu0 %v415_v29  ;;  %vm402_vm15 = vcmp.gt.f32.partialorder %v398_v6, 0.0  ;;  %v772_v35 = vsel %vm764_vm14, %v760_v4, %v768_v15  ;;  %v406_v36 = vmul.f32 0.2, %v398_v6  ;;  %v299_v37 = vadd.f32 %v3118_v58, %v3089_v26 }
 0x1fe   :  { %vm301_vm1 = vcmp.gt.f32.partialorder %v297_v7, 0.0  ;;  %v305_v39 = vmul.f32 0.2, %v297_v7  ;;  %v778_v40 = vsel %vm317_vm7, %v3148_v32, -inf  ;;  %v421_v42 = vsel %vm317_vm7, %v3152_v34, -inf }
 0x1ff   :  { %v410_v43 = vsel %vm402_vm15, %v398_v6, %v406_v36  ;;  %v3163_v45 = vsel %vm108_vm9, %v772_v35, -1e+30  ;;  %v601_v26 = vrot.slane %v263_v56, %v600_v31  ;;  %v307_v49 = vmul.f32 0.2, %v299_v37 }
 0x200   :  { %v3167_v46 = vsel %vm109_vm0, %v410_v43, -1e+30  ;;  %v309_v47 = vsel %vm301_vm1, %v297_v7, %v305_v39  ;;  %v300_v57 = vadd.f32 %v3118_v58, %v3095_v38  ;;  %vm303_vm2 = vcmp.gt.f32.partialorder %v299_v37, 0.0 }
 0x201   :  { %779 = vmax.xlane.f32.xlu1 %v778_v40  ;;  %422 = vmax.xlane.f32.xlu0 %v421_v42  ;;  %v784_v59 = vsel %vm317_vm7, %v3163_v45, -inf  ;;  %v424_v61 = vsel %vm317_vm7, %v3167_v46, -inf  ;;  %v3179_v62 = vsel %vm106_vm8, %v309_v47, -1e+30  ;;  %v311_v63 = vsel %vm303_vm2, %v299_v37, %v307_v49  ;;  %v744_v37 = vpop.permute.xlu0 %743 }
 0x202   :  { %v308_v56 = vmul.f32 0.2, %v300_v57  ;;  %v602_v2 = vadd.f32 %v601_v26, %v3093_v33  ;;  %vm304_vm10 = vcmp.gt.f32.partialorder %v300_v57, 0.0  ;;  %v318_v38 = vsel %vm317_vm7, %v3179_v62, -inf }
 0x203   :  { %v3186_v3 = vsel %vm108_vm9, %v311_v63, -1e+30  ;;  %v298_v7 = vadd.f32 %v3118_v58, %v3091_v30  ;;  %v604_v11 = vadd.f32 %v601_v26, %v3087_v25  ;;  %v603_v24 = vadd.f32 %v601_v26, %v588_v14 }
 0x204   :  { %v312_v4 = vsel %vm304_vm10, %v300_v57, %v308_v56  ;;  %v610_v6 = vmul.f32 0.2, %v602_v2  ;;  %vm606_vm11 = vcmp.gt.f32.partialorder %v602_v2, 0.0  ;;  %v324_v8 = vsel %vm317_vm7, %v3186_v3, -inf }
 0x205   :  { %785 = vmax.xlane.f32.xlu1 %v784_v59  ;;  %425 = vmax.xlane.f32.xlu0 %v424_v61  ;;  %v3194_v33 = vsel %vm109_vm0, %v312_v4, -1e+30  ;;  %v306_v10 = vmul.f32 0.2, %v298_v7  ;;  %vm302_vm12 = vcmp.gt.f32.partialorder %v298_v7, 0.0  ;;  %vm608_vm13 = vcmp.gt.f32.partialorder %v604_v11, 0.0 }
 0x206   :  { %v614_v9 = vsel %vm606_vm11, %v602_v2, %v610_v6  ;;  %v327_v12 = vsel %vm317_vm7, %v3194_v33, -inf  ;;  %v612_v15 = vmul.f32 0.2, %v604_v11  ;;  %v611_v29 = vmul.f32 0.2, %v603_v24 }
 0x207   :  { %v3201_v30 = vsel %vm106_vm8, %v614_v9, -1e+30  ;;  %v310_v58 = vsel %vm302_vm12, %v298_v7, %v306_v10  ;;  %v605_v35 = vadd.f32 %v601_v26, %v3097_v41  ;;  %vm607_vm14 = vcmp.gt.f32.partialorder %v603_v24, 0.0 }
 0x208   :  { %v622_v27 = vsel %vm317_vm7, %v3201_v30, -inf  ;;  %v3207_v25 = vsel %vm107_vm6, %v310_v58, -1e+30  ;;  %v616_v28 = vsel %vm608_vm13, %v604_v11, %v612_v15  ;;  %v615_v40 = vsel %vm607_vm14, %v603_v24, %v611_v29 }
 0x209   :  { %319 = vmax.xlane.f32.xlu0 %v318_v38  ;;  %v321_v36 = vsel %vm317_vm7, %v3207_v25, -inf  ;;  %v3214_v39 = vsel %vm108_vm9, %v616_v28, -1e+30  ;;  %v613_v42 = vmul.f32 0.2, %v605_v35  ;;  %v759_v43 = vadd.f32 %v3123_v60, %v744_v37 }
 0x20a   :  { %vm609_vm15 = vcmp.gt.f32.partialorder %v605_v35, 0.0  ;;  %v628_v47 = vsel %vm317_vm7, %v3214_v39, -inf  ;;  %v3221_v41 = vsel %vm107_vm6, %v615_v40, -1e+30  ;;  %v761_v57 = vadd.f32 %v3123_v60, %v3102_v48 }
 0x20b   :  { %v617_v26 = vsel %vm609_vm15, %v605_v35, %v613_v42  ;;  %v767_v49 = vmul.f32 0.2, %v759_v43  ;;  %vm763_vm1 = vcmp.gt.f32.partialorder %v759_v43, 0.0  ;;  %v625_v59 = vsel %vm317_vm7, %v3221_v41, -inf }
 0x20c   :  { %v3229_v61 = vsel %vm109_vm0, %v617_v26, -1e+30  ;;  %v769_v56 = vmul.f32 0.2, %v761_v57  ;;  %vm765_vm2 = vcmp.gt.f32.partialorder %v761_v57, 0.0  ;;  %vm668_vm10 = vcmp.ge.s32.totalorder %v3036_v13, 32 }
 0x20d   :  { %325 = vmax.xlane.f32.xlu0 %v324_v8  ;;  %v771_v63 = vsel %vm763_vm1, %v759_v43, %v767_v49  ;;  %v631_v2 = vsel %vm317_vm7, %v3229_v61, -inf  ;;  %vm669_vm11 = vcmp.lt.s32.totalorder %v3036_v13, 48  ;;  %vm824_vm14 = vcmp.ge.s32.totalorder %v3036_v13, 48 }
 0x20e   :  { %v3235_v38 = vsel %vm107_vm6, %v771_v63, -1e+30  ;;  %v773_v48 = vsel %vm765_vm2, %v761_v57, %v769_v56  ;;  %vm670_vm12 = vmand %vm668_vm10, %vm669_vm11  ;;  %vm825_vm15 = vcmp.lt.s32.totalorder %v3036_v13, 64 }
 0x20f   :  { %v781_v60 = vsel %vm317_vm7, %v3235_v38, -inf  ;;  %v3241_v4 = vsel %vm109_vm0, %v773_v48, -1e+30  ;;  %vm3339_vm13 = vmpackc.low %vm670_vm12, %vm670_vm12 }
 0x210   :  { %v787_v6 = vsel %vm317_vm7, %v3241_v4, -inf  ;;  %vm826_vm1 = vmand %vm824_vm14, %vm825_vm15 }
 0x211   :  { %328 = vmax.xlane.f32.xlu0 %v327_v12  ;;  %vm3365_vm2 = vmpackc.low %vm826_vm1, %vm826_vm1 }
 0x215   :  { %623 = vmax.xlane.f32.xlu0 %v622_v27 }
 0x219   :  { %322 = vmax.xlane.f32.xlu0 %v321_v36 }
 0x21d   :  { %629 = vmax.xlane.f32.xlu0 %v628_v47 }
 0x221   :  { %626 = vmax.xlane.f32.xlu0 %v625_v59 }
 0x225   :  { %632 = vmax.xlane.f32.xlu0 %v631_v2 }
 0x229   :  { %782 = vmax.xlane.f32.xlu0 %v781_v60 }
 0x22d   :  { %788 = vmax.xlane.f32.xlu0 %v787_v6 }
 0x286   :  { %v420_v7 = vpop.xlane.xlu1 %419  ;;  %v417_v8 = vpop.xlane.xlu0 %416 }
 0x287   :  { %v428_v9 = vsub.f32 %v3135_v16, %v420_v7  ;;  %v427_v10 = vsub.f32 %v3139_v21, %v417_v8 }
 0x289   :  { %v433_v11 = vmul.f32 1.442695, %v428_v9  ;;  %v431_v12 = vmul.f32 1.442695, %v427_v10 }
 0x28a   :  { %v423_v14 = vpop.xlane.xlu0 %422  ;;  %v780_v49 = vpop.xlane.xlu1 %779 }
 0x28b   :  { %2640 = vpow2.f32 %v433_v11  ;;  %v429_v58 = vsub.f32 %v3152_v34, %v423_v14  ;;  %v790_v6 = vsub.f32 %v3148_v32, %v780_v49 }
 0x28c   :  { %2642 = vpow2.f32 %v431_v12 }
 0x28d   :  { %v435_v15 = vmul.f32 1.442695, %v429_v58  ;;  %v794_v12 = vmul.f32 1.442695, %v790_v6 }
 0x28e   :  { %v426_v24 = vpop.xlane.xlu0 %425  ;;  %v786_v9 = vpop.xlane.xlu1 %785 }
 0x28f   :  { %v430_v27 = vsub.f32 %v3167_v46, %v426_v24  ;;  %2644 = vpow2.f32 %v435_v15 }
 0x291   :  { %v437_v28 = vmul.f32 1.442695, %v430_v27 }
 0x292   :  { %v320_v29 = vpop.xlane.xlu0 %319 }
 0x293   :  { %v330_v35 = vsub.f32 %v3179_v62, %v320_v29  ;;  %2646 = vpow2.f32 %v437_v28 }
 0x295   :  { %v334_v16 = vmul.f32 1.442695, %v330_v35 }
 0x296   :  { %v326_v36 = vpop.xlane.xlu0 %325 }
 0x297   :  { %2648 = vpow2.f32 %v334_v16  ;;  %v332_v21 = vsub.f32 %v3186_v3, %v326_v36 }
 0x298   :  { %v3251_v37 = vpop.eup %2640 }
 0x299   :  { %v3253_v40 = vpop.eup %2642  ;;  %v338_v34 = vmul.f32 1.442695, %v332_v21  ;;  %v442_v42 = vsel %vm317_vm7, %v3251_v37, 0.0 }
 0x29a   :  { %v439_v46 = vsel %vm317_vm7, %v3253_v40, 0.0  ;;  %443 = vadd.xlane.f32.xlu0 %v442_v42  ;;  %v329_v43 = vpop.xlane.xlu0 %328 }
 0x29b   :  { %2650 = vpow2.f32 %v338_v34  ;;  %440 = vadd.xlane.f32.xlu1 %v439_v46  ;;  %v333_v59 = vsub.f32 %v3194_v33, %v329_v43 }
 0x29c   :  { %v3259_v62 = vpop.eup %2644 }
 0x29d   :  { %v445_v3 = vsel %vm317_vm7, %v3259_v62, 0.0  ;;  %v340_v7 = vmul.f32 1.442695, %v333_v59 }
 0x29e   :  { %v624_v47 = vpop.xlane.xlu0 %623 }
 0x29f   :  { %446 = vadd.xlane.f32.xlu1 %v445_v3  ;;  %v634_v26 = vsub.f32 %v3201_v30, %v624_v47 }
 0x2a0   :  { %v3264_v57 = vpop.eup %2646 }
 0x2a1   :  { %v638_v63 = vmul.f32 1.442695, %v634_v26  ;;  %v448_v56 = vsel %vm317_vm7, %v3264_v57, 0.0 }
 0x2a2   :  { %v323_v2 = vpop.xlane.xlu0 %322  ;;  %449 = vadd.xlane.f32.xlu0 %v448_v56 }
 0x2a3   :  { %2652 = vpow2.f32 %v638_v63  ;;  %v331_v48 = vsub.f32 %v3207_v25, %v323_v2  ;;  %v792_v25 = vsub.f32 %v3163_v45, %v786_v9 }
 0x2a4   :  { %v3270_v60 = vpop.eup %2648 }
 0x2a5   :  { %v336_v30 = vmul.f32 1.442695, %v331_v48  ;;  %v342_v8 = vsel %vm317_vm7, %v3270_v60, 0.0  ;;  %v798_v24 = vmul.f32 1.442695, %v792_v25 }
 0x2a6   :  { %343 = vadd.xlane.f32.xlu1 %v342_v8  ;;  %v630_v33 = vpop.xlane.xlu0 %629 }
 0x2a7   :  { %2654 = vpow2.f32 %v336_v30  ;;  %v636_v10 = vsub.f32 %v3214_v39, %v630_v33 }
 0x2a8   :  { %v3276_v11 = vpop.eup %2650  ;;  %2656 = vpow2.f32 %v340_v7 }
 0x2a9   :  { %v642_v14 = vmul.f32 1.442695, %v636_v10  ;;  %v348_v32 = vsel %vm317_vm7, %v3276_v11, 0.0 }
 0x2aa   :  { %349 = vadd.xlane.f32.xlu1 %v348_v32  ;;  %v627_v58 = vpop.xlane.xlu0 %626 }
 0x2ab   :  { %2658 = vpow2.f32 %v642_v14  ;;  %v635_v15 = vsub.f32 %v3221_v41, %v627_v58 }
 0x2ac   :  { %2660 = vpow2.f32 %v794_v12 }
 0x2ad   :  { %v640_v27 = vmul.f32 1.442695, %v635_v15 }
 0x2ae   :  { %v633_v28 = vpop.xlane.xlu0 %632 }
 0x2af   :  { %2662 = vpow2.f32 %v640_v27  ;;  %v637_v39 = vsub.f32 %v3229_v61, %v633_v28 }
 0x2b0   :  { %v3283_v29 = vpop.eup %2652  ;;  %2664 = vpow2.f32 %v798_v24 }
 0x2b1   :  { %v644_v45 = vmul.f32 1.442695, %v637_v39  ;;  %v646_v35 = vsel %vm317_vm7, %v3283_v29, 0.0 }
 0x2b2   :  { %647 = vadd.xlane.f32.xlu1 %v646_v35  ;;  %v783_v16 = vpop.xlane.xlu0 %782 }
 0x2b3   :  { %2666 = vpow2.f32 %v644_v45  ;;  %v791_v36 = vsub.f32 %v3235_v38, %v783_v16 }
 0x2b4   :  { %v3288_v41 = vpop.eup %2654 }
 0x2b5   :  { %v796_v21 = vmul.f32 1.442695, %v791_v36  ;;  %v345_v34 = vsel %vm317_vm7, %v3288_v41, 0.0  ;;  %v3292_v42 = vpop.eup %2656 }
 0x2b6   :  { %346 = vadd.xlane.f32.xlu0 %v345_v34  ;;  %v789_v61 = vpop.xlane.xlu0 %788  ;;  %v351_v47 = vsel %vm317_vm7, %v3292_v42, 0.0 }
 0x2b7   :  { %2668 = vpow2.f32 %v796_v21  ;;  %v793_v46 = vsub.f32 %v3241_v4, %v789_v61 }
 0x2b8   :  { %v3295_v43 = vpop.eup %2658 }
 0x2b9   :  { %v800_v3 = vmul.f32 1.442695, %v793_v46  ;;  %v652_v38 = vsel %vm317_vm7, %v3295_v43, 0.0  ;;  %v3301_v26 = vpop.eup %2660 }
 0x2ba   :  { %352 = vadd.xlane.f32.xlu0 %v351_v47  ;;  %653 = vadd.xlane.f32.xlu1 %v652_v38  ;;  %v802_v59 = vsel %vm317_vm7, %v3301_v26, 0.0 }
 0x2bb   :  { %2670 = vpow2.f32 %v800_v3 }
 0x2bc   :  { %v3303_v49 = vpop.eup %2662 }
 0x2bd   :  { %v649_v4 = vsel %vm317_vm7, %v3303_v49, 0.0  ;;  %v3309_v63 = vpop.eup %2664 }
 0x2be   :  { %803 = vadd.xlane.f32.xlu1 %v802_v59  ;;  %650 = vadd.xlane.f32.xlu0 %v649_v4  ;;  %v808_v2 = vsel %vm317_vm7, %v3309_v63, 0.0 }
 0x2c0   :  { %v3311_v56 = vpop.eup %2666 }
 0x2c1   :  { %v655_v48 = vsel %vm317_vm7, %v3311_v56, 0.0 }
 0x2c2   :  { %809 = vadd.xlane.f32.xlu1 %v808_v2  ;;  %656 = vadd.xlane.f32.xlu0 %v655_v48 }
 0x2c4   :  { %v3317_v6 = vpop.eup %2668 }
 0x2c5   :  { %v805_v7 = vsel %vm317_vm7, %v3317_v6, 0.0 }
 0x2c6   :  { %806 = vadd.xlane.f32.xlu0 %v805_v7 }
 0x2c8   :  { %v3321_v30 = vpop.eup %2670 }
 0x2c9   :  { %v811_v8 = vsel %vm317_vm7, %v3321_v30, 0.0 }
 0x2ca   :  { %812 = vadd.xlane.f32.xlu0 %v811_v8 }
 0x323   :  { %v444_v9 = vpop.xlane.xlu0 %443 }
 0x324   :  { %v441_v33 = vpop.xlane.xlu1 %440  ;;  %2672 = vrcp.f32 %v444_v9 }
 0x325   :  { %2674 = vrcp.f32 %v441_v33 }
 0x328   :  { %v447_v10 = vpop.xlane.xlu1 %446 }
 0x329   :  { %2676 = vrcp.f32 %v447_v10 }
 0x32b   :  { %v450_v12 = vpop.xlane.xlu0 %449 }
 0x32c   :  { %2678 = vrcp.f32 %v450_v12 }
 0x32f   :  { %v344_v15 = vpop.xlane.xlu1 %343 }
 0x330   :  { %2680 = vrcp.f32 %v344_v15 }
 0x331   :  { %v2673_v25 = vpop.eup %2672 }
 0x332   :  { %v2675_v14 = vpop.eup %2674  ;;  %v456_v32 = vmul.f32 %v2673_v25, %v3251_v37 }
 0x333   :  { %v455_v58 = vmul.f32 %v2675_v14, %v3253_v40  ;;  %v350_v39 = vpop.xlane.xlu1 %349 }
 0x335   :  { %v459_v24 = vpack.c.bf16 %v456_v32, %v455_v58  ;;  %v2637_v32 = vld [vmem:[#allocation10 + $0x10] sm:$0xff]  }
 0x336   :  { %v2677_v27 = vpop.eup %2676 }
 0x337   :  { %2444 = vmatprep.mubr.msk.bf16.mxu1 %vm317_vm7, %v459_v24  ;;  %v457_v45 = vmul.f32 %v2677_v27, %v3259_v62 }
 0x339   :  { %v2679_v28 = vpop.eup %2678 }
 0x33a   :  { %v458_v35 = vmul.f32 %v2679_v28, %v3264_v57 }
 0x33b   :  { %v648_v37 = vpop.xlane.xlu1 %647 }
 0x33c   :  { %v460_v16 = vpack.c.bf16 %v458_v35, %v457_v45  ;;  %v2625_v35 = vld [vmem:[#allocation8 + $0x30] sm:$0xff]  }
 0x33d   :  { %v2681_v61 = vpop.eup %2680 }
 0x33e   :  { %2445 = vmatmul.mubr.msk.bf16.vlgmr.msra.gmra.mxu1 %vm317_vm7, %v460_v16  ;;  %v358_v47 = vmul.f32 %v2681_v61, %v3270_v60  ;;  %v2626_v16 = vld [vmem:[#allocation8 + $0x28] sm:$0xff]  }
 0x33f   :  { %v347_v40 = vpop.xlane.xlu0 %346  ;;  %2449 = vmatpush3.bf16.msk.msra.mxu1 %vm3065_vm5, %v3044_v18 }
 0x340   :  { %2682 = vrcp.f32 %v347_v40  ;;  %2450 = vmatprep.subr.msk.bf16.mxu1 %vm3065_vm5, %v3048_v22  ;;  %v2631_v40 = vld [vmem:[#allocation8] sm:$0xff]  }
 0x341   :  { %2684 = vrcp.f32 %v350_v39 }
 0x343   :  { %v654_v57 = vpop.xlane.xlu1 %653  ;;  %v353_v36 = vpop.xlane.xlu0 %352  ;;  %2451 = vmatpush3.bf16.msk.msra.mxu1 %vm3065_vm5, %v3048_v22 }
 0x344   :  { %2456 = vmatprep.subr.msk.bf16.mxu1 %vm3339_vm13, %v3044_v18  ;;  %2686 = vrcp.f32 %v353_v36 }
 0x345   :  { %2688 = vrcp.f32 %v648_v37  ;;  %v2627_v37 = vld [vmem:[#allocation8 + $0x20] sm:$0xff]  }
 0x347   :  { %v651_v21 = vpop.xlane.xlu0 %650  ;;  %v804_v34 = vpop.xlane.xlu1 %803 }
 0x348   :  { %2690 = vrcp.f32 %v651_v21 }
 0x349   :  { %2692 = vrcp.f32 %v654_v57 }
 0x34b   :  { %v657_v46 = vpop.xlane.xlu0 %656  ;;  %v810_v59 = vpop.xlane.xlu1 %809 }
 0x34c   :  { %2694 = vrcp.f32 %v657_v46 }
 0x34d   :  { %v2683_v3 = vpop.eup %2682  ;;  %2696 = vrcp.f32 %v804_v34 }
 0x34e   :  { %v359_v38 = vmul.f32 %v2683_v3, %v3288_v41  ;;  %v2685_v2 = vpop.eup %2684 }
 0x34f   :  { %v807_v4 = vpop.xlane.xlu0 %806  ;;  %v360_v9 = vmul.f32 %v2685_v2, %v3276_v11 }
 0x350   :  { %2698 = vrcp.f32 %v807_v4  ;;  %v362_v48 = vpack.c.bf16 %v359_v38, %v358_v47 }
 0x351   :  { %v2687_v7 = vpop.eup %2686  ;;  %2700 = vrcp.f32 %v810_v59 }
 0x352   :  { %2452 = vmatprep.mubr.msk.bf16.mxu1 %vm317_vm7, %v362_v48  ;;  %v361_v33 = vmul.f32 %v2687_v7, %v3292_v42  ;;  %v2689_v10 = vpop.eup %2688 }
 0x353   :  { %v813_v8 = vpop.xlane.xlu0 %812  ;;  %v662_v12 = vmul.f32 %v2689_v10, %v3283_v29 }
 0x354   :  { %2702 = vrcp.f32 %v813_v8  ;;  %v363_v60 = vpack.c.bf16 %v361_v33, %v360_v9 }
 0x355   :  { %v2691_v41 = vpop.eup %2690 }
 0x356   :  { %2453 = vmatmul.mubr.msk.bf16.vlgmr.msra.gmra.mxu1 %vm317_vm7, %v363_v60  ;;  %v663_v25 = vmul.f32 %v2691_v41, %v3303_v49  ;;  %v2693_v14 = vpop.eup %2692 }
 0x357   :  { %2457 = vmatpush3.bf16.msk.msra.mxu1 %vm3339_vm13, %v3044_v18  ;;  %v664_v29 = vmul.f32 %v2693_v14, %v3295_v43 }
 0x358   :  { %2458 = vmatprep.subr.msk.bf16.mxu1 %vm3339_vm13, %v3048_v22  ;;  %v666_v11 = vpack.c.bf16 %v663_v25, %v662_v12 }
 0x359   :  { %v2695_v42 = vpop.eup %2694 }
 0x35a   :  { %v2697_v58 = vpop.eup %2696  ;;  %2460 = vmatprep.mubr.msk.bf16.mxu1 %vm317_vm7, %v666_v11  ;;  %v665_v49 = vmul.f32 %v2695_v42, %v3311_v56 }
 0x35b   :  { %2459 = vmatpush3.bf16.msk.msra.mxu1 %vm3339_vm13, %v3048_v22  ;;  %v818_v27 = vmul.f32 %v2697_v58, %v3301_v26  ;;  %v2283_v58 = vld [vmem:[%s3824_s3] ss:$0 sm:$0xff] }
 0x35c   :  { %2464 = vmatprep.subr.msk.bf16.mxu1 %vm3365_vm2, %v3044_v18  ;;  %v667_v24 = vpack.c.bf16 %v665_v49, %v664_v29 }
 0x35d   :  { %v2699_v15 = vpop.eup %2698 }
 0x35e   :  { %v819_v28 = vmul.f32 %v2699_v15, %v3317_v6  ;;  %v2701_v39 = vpop.eup %2700  ;;  %2461 = vmatmul.mubr.msk.bf16.vlgmr.msra.gmra.mxu1 %vm317_vm7, %v667_v24 }
 0x35f   :  { %2465 = vmatpush3.bf16.msk.msra.mxu1 %vm3365_vm2, %v3044_v18  ;;  %v820_v45 = vmul.f32 %v2701_v39, %v3309_v63  ;;  %v2624_v18 = vld [vmem:[#allocation8 + $0x38] sm:$0xff]  }
 0x360   :  { %v822_v43 = vpack.c.bf16 %v819_v28, %v818_v27  ;;  %2466 = vmatprep.subr.msk.bf16.mxu1 %vm3365_vm2, %v3048_v22  ;;  %2472 = vmatprep.subr.bf16.mxu0 %v2624_v18  ;;  %v2628_v63 = vld [vmem:[#allocation8 + $0x18] sm:$0xff]  }
 0x361   :  { %v2703_v56 = vpop.eup %2702  ;;  %2473 = vmatpush3.bf16.msra.mxu0 %v2624_v18 }
 0x362   :  { %2468 = vmatprep.mubr.msk.bf16.mxu1 %vm317_vm7, %v822_v43  ;;  %v821_v26 = vmul.f32 %v2703_v56, %v3321_v30  ;;  %2474 = vmatprep.subr.bf16.mxu0 %v2625_v35  ;;  %v2629_v30 = vld [vmem:[#allocation8 + $0x10] sm:$0xff]  }
 0x363   :  { %2467 = vmatpush3.bf16.msk.msra.mxu1 %vm3365_vm2, %v3048_v22  ;;  %v2630_v22 = vld [vmem:[#allocation8 + $0x8] sm:$0xff]  }
 0x364   :  { %v823_v6 = vpack.c.bf16 %v821_v26, %v820_v45 }
 0x365   :  { %2475 = vmatpush3.bf16.msra.mxu0 %v2625_v35 }
 0x366   :  { %2469 = vmatmul.mubr.msk.bf16.vlgmr.msra.gmra.mxu1 %vm317_vm7, %v823_v6  ;;  %2476 = vmatprep.subr.bf16.mxu0 %v2626_v16 }
 0x369   :  { %2477 = vmatpush3.bf16.msra.mxu0 %v2626_v16 }
 0x36a   :  { %2478 = vmatprep.subr.bf16.mxu0 %v2627_v37 }
 0x36d   :  { %2479 = vmatpush3.bf16.msra.mxu0 %v2627_v37 }
 0x36e   :  { %2480 = vmatprep.subr.bf16.mxu0 %v2628_v63 }
 0x371   :  { %2481 = vmatpush3.bf16.msra.mxu0 %v2628_v63 }
 0x372   :  { %2482 = vmatprep.subr.bf16.mxu0 %v2629_v30 }
 0x375   :  { %2483 = vmatpush3.bf16.msra.mxu0 %v2629_v30 }
 0x376   :  { %2484 = vmatprep.subr.bf16.mxu0 %v2630_v22 }
 0x379   :  { %2485 = vmatpush3.bf16.msra.mxu0 %v2630_v22 }
 0x37a   :  { %2486 = vmatprep.subr.bf16.mxu0 %v2631_v40 }
 0x37d   :  { %2487 = vmatpush3.bf16.msra.mxu0 %v2631_v40 }
 0x3fe   :  { %v2446_v57 = vpop.f32.mrf.mxu1 }
 0x400   :  { %v512_v36 = vpop.f32.mrf.mxu1 }
 0x402   :  { %v2447_v21 = vpop.f32.mrf.mxu1 }
 0x404   :  { %v515_v34 = vpop.f32.mrf.mxu1 }
 0x416   :  { %v2454_v61 = vpop.f32.mrf.mxu1 }
 0x417   :  { %v576_v7 = vadd.f32 %v2454_v61, %v2446_v57 }
 0x418   :  { %v567_v46 = vpop.f32.mrf.mxu1 }
 0x419   :  { %v568_v48 = vadd.f32 %v567_v46, %v512_v36 }
 0x41a   :  { %v2455_v3 = vpop.f32.mrf.mxu1 }
 0x41b   :  { %v579_v9 = vadd.f32 %v2455_v3, %v2447_v21 }
 0x41c   :  { %v570_v47 = vpop.f32.mrf.mxu1 }
 0x41d   :  { %v571_v41 = vadd.f32 %v570_v47, %v515_v34 }
 0x41e   :  { %v2462_v38 = vpop.f32.mrf.mxu1 }
 0x41f   :  { %v736_v10 = vadd.f32 %v2462_v38, %v576_v7 }
 0x420   :  { %v719_v59 = vpop.f32.mrf.mxu1 }
 0x421   :  { %v734_v33 = vadd.f32 %v719_v59, %v568_v48 }
 0x422   :  { %v2463_v4 = vpop.f32.mrf.mxu1 }
 0x423   :  { %v737_v12 = vadd.f32 %v2463_v4, %v579_v9 }
 0x424   :  { %v722_v2 = vpop.f32.mrf.mxu1 }
 0x425   :  { %v735_v42 = vadd.f32 %v722_v2, %v571_v41 }
 0x426   :  { %v2470_v8 = vpop.f32.mrf.mxu1 }
 0x427   :  { %v892_v14 = vadd.f32 %v2470_v8, %v736_v10 }
 0x428   :  { %v875_v60 = vpop.f32.mrf.mxu1 }
 0x429   :  { %v890_v25 = vadd.f32 %v875_v60, %v734_v33  ;;  %v903_v28 = vadd.f32 %v2283_v58, %v892_v14 }
 0x42a   :  { %v2471_v11 = vpop.f32.mrf.mxu1 }
 0x42b   :  { %v893_v29 = vadd.f32 %v2471_v11, %v737_v12  ;;  %v901_v15 = vadd.f32 %v2283_v58, %v890_v25  ;;  %v907_v26 = vmax.f32 %v903_v28, 0.0 }
 0x42c   :  { %v878_v49 = vpop.f32.mrf.mxu1 }
 0x42d   :  { %v904_v24 = vadd.f32 %v2283_v58, %v893_v29  ;;  %v891_v27 = vadd.f32 %v878_v49, %v735_v42  ;;  %v905_v56 = vmax.f32 %v901_v15, 0.0 }
 0x42f   :  { %v902_v39 = vadd.f32 %v2283_v58, %v891_v27  ;;  %v908_v43 = vmax.f32 %v904_v24, 0.0 }
 0x431   :  { %v906_v45 = vmax.f32 %v902_v39, 0.0  ;;  %v910_v18 = vpack.c.bf16 %v908_v43, %v907_v26 }
 0x433   :  { %v909_v6 = vpack.c.bf16 %v906_v45, %v905_v56 }
 0x435   :  { %2488 = vmatprep.mubr.bf16.mxu0 %v909_v6 }
 0x436   :  { %2489 = vmatmul.mubr.bf16.vlgmr.msra.gmra.mxu0 %v910_v18 }
 0x4f6   :  { %v2490_v35 = vpop.f32.mrf.mxu0 }
 0x4f7   :  { %1363 = vperm.xlu0 %2596, %v2490_v35   ;;  %1161 = vperm.xlu1 %2594, %v2490_v35  }
 0x4f8   :  { %v1009_v16 = vpop.f32.mrf.mxu0 }
 0x4fa   :  { %v2491_v37 = vpop.f32.mrf.mxu0 }
 0x4fb   :  { %v3397_v63 = vpack.c.bf16 %v2491_v37, %v2490_v35  ;;  %2597 = vset.pattern.permute.xlu0 %v2953_v19  ;;  %2595 = vset.pattern.permute.xlu1 %v2954_v20 }
 0x4fc   :  { %1514 = vperm.xlu0 %2597, %v2490_v35   ;;  %1068 = vperm.xlu1 %2595, %v2490_v35   ;;  %v1012_v30 = vpop.f32.mrf.mxu0 }
 0x4fd   :  { %v3401_v22 = vpack.c.bf16 %v1012_v30, %v1009_v16  ;;  %2492 = vmatprep.subr.msk.bf16.mxu1 %vm3040_vm3, %v3397_v63 }
 0x4fe   :  { %2493 = vmatpush3.bf16.msk.msra.mxu1 %vm3040_vm3, %v3397_v63 }
 0x4ff   :  { %2494 = vmatprep.subr.msk.bf16.mxu1 %vm3040_vm3, %v3401_v22 }
 0x500   :  { %2600 = vset.pattern.permute.xlu0 %v2951_v0  ;;  %2598 = vset.pattern.permute.xlu1 %v2952_v1 }
 0x501   :  { %1355 = vperm.xlu0 %2600, %v1009_v16   ;;  %1153 = vperm.xlu1 %2598, %v1009_v16  }
 0x502   :  { %2495 = vmatpush3.bf16.msk.msra.mxu1 %vm3040_vm3, %v3401_v22 }
 0x503   :  { %2500 = vmatprep.subr.msk.bf16.mxu1 %vm3065_vm5, %v3397_v63 }
 0x505   :  { %2601 = vset.pattern.permute.xlu0 %v2953_v19  ;;  %2599 = vset.pattern.permute.xlu1 %v2954_v20 }
 0x506   :  { %1506 = vperm.xlu0 %2601, %v1009_v16   ;;  %1058 = vperm.xlu1 %2599, %v1009_v16  }
 0x50a   :  { %2604 = vset.pattern.permute.xlu0 %v2951_v0  ;;  %2602 = vset.pattern.permute.xlu1 %v2952_v1 }
 0x50b   :  { %1367 = vperm.xlu0 %2604, %v2491_v37   ;;  %1165 = vperm.xlu1 %2602, %v2491_v37  }
 0x50f   :  { %2605 = vset.pattern.permute.xlu0 %v2953_v19  ;;  %2603 = vset.pattern.permute.xlu1 %v2954_v20 }
 0x510   :  { %1518 = vperm.xlu0 %2605, %v2491_v37   ;;  %1073 = vperm.xlu1 %2603, %v2491_v37  }
 0x514   :  { %2606 = vset.pattern.permute.xlu0 %v2952_v1  ;;  %1063 = vperm.xlu1 %2603, %v1012_v30  }
 0x515   :  { %1157 = vperm.xlu0 %2606, %v1012_v30  }
 0x519   :  { %2607 = vset.pattern.permute.xlu0 %v2951_v0 }
 0x51a   :  { %1359 = vperm.xlu0 %2607, %v1012_v30  }
 0x51e   :  { %2608 = vset.pattern.permute.xlu0 %v2953_v19 }
 0x51f   :  { %1510 = vperm.xlu0 %2608, %v1012_v30  }
 0x53d   :  { %1024 = vxpose.xlu1.b32.start [1/4] (short) (narrow) %v1009_v16, 72 }
 0x541   :  { %1025 = vxpose.xlu1.b32.cont [2/4] (short) (narrow) %v1012_v30, 72 }
 0x545   :  { %1026 = vxpose.xlu1.b32.cont [3/4] (short) (narrow) %v2490_v35, 72 }
 0x549   :  { %1027 = vxpose.xlu1.b32.end [4/4] (short) (narrow) %v2491_v37, 72 }
 0x572   :  { %v1162_v17 = vpop.permute.xlu1 %1161  ;;  %v3431_v21 = vpop.permute.xlu0 %1363 }
 0x577   :  { %v3429_v40 = vpop.permute.xlu1 %1068  ;;  %v3435_v34 = vpop.permute.xlu0 %1514 }
 0x57c   :  { %v1154_v20 = vpop.permute.xlu1 %1153  ;;  %v3439_v19 = vpop.permute.xlu0 %1355 }
 0x581   :  { %v1059_v57 = vpop.permute.xlu1 %1058  ;;  %v3441_v3 = vpop.permute.xlu0 %1506 }
 0x586   :  { %v1166_v36 = vpop.permute.xlu1 %1165  ;;  %v1368_v38 = vpop.permute.xlu0 %1367 }
 0x58b   :  { %v3433_v1 = vpop.permute.xlu1 %1073  ;;  %v1519_v2 = vpop.permute.xlu0 %1518 }
 0x58f   :  { %v3437_v0 = vpop.permute.xlu1 %1063 }
 0x590   :  { %v1158_v7 = vpop.permute.xlu0 %1157 }
 0x595   :  { %v3443_v33 = vpop.permute.xlu0 %1359 }
 0x59a   :  { %v1511_v14 = vpop.permute.xlu0 %1510 }
 0x5b9   :  { %v1040_v61 = vpop.trf.xlu1 }
 0x5bd   :  { %v1041_v46 = vpop.trf.xlu1 }
 0x5c1   :  { %v1042_v47 = vpop.trf.xlu1 }
 0x5c5   :  { %v1043_v59 = vpop.trf.xlu1 }
 0x5c9   :  { %v1044_v4 = vpop.trf.xlu1 }
 0x5cd   :  { %v1045_v48 = vpop.trf.xlu1 }
 0x5d1   :  { %v1046_v8 = vpop.trf.xlu1 }
 0x5d5   :  { %v1047_v9 = vpop.trf.xlu1 }
 0x5d9   :  { %v1048_v10 = vpop.trf.xlu1 }
 0x5da   :  { %v3446_v60 = vrot.slane %v1048_v10, %v3105_v50  ;;  %v1171_v41 = vrot.slane %v1048_v10, %v3108_v51  ;;  %v3451_v12 = vrot.slane %v1048_v10, %v600_v31  ;;  %v3455_v25 = vrot.slane %v1048_v10, %v756_v52 }
 0x5dc   :  { %v1172_v11 = vadd.f32 %v1171_v41, %v1154_v20  ;;  %v1173_v42 = vadd.f32 %v1171_v41, %v1158_v7  ;;  %v1174_v58 = vadd.f32 %v1171_v41, %v1162_v17  ;;  %v1377_v29 = vadd.f32 %v3451_v12, %v1368_v38 }
 0x5dd   :  { %v1175_v49 = vadd.f32 %v1171_v41, %v1166_v36  ;;  %v1526_v15 = vadd.f32 %v3455_v25, %v1511_v14  ;;  %v1080_v24 = vadd.f32 %v3446_v60, %v1059_v57  ;;  %v1528_v27 = vadd.f32 %v3455_v25, %v1519_v2 }
 0x5de   :  { %vm1176_vm3 = vcmp.gt.f32.partialorder %v1172_v11, 0.0  ;;  %v1180_v31 = vmul.f32 0.2, %v1172_v11  ;;  %vm1177_vm10 = vcmp.gt.f32.partialorder %v1173_v42, 0.0  ;;  %v1181_v28 = vmul.f32 0.2, %v1173_v42 }
 0x5df   :  { %vm1178_vm11 = vcmp.gt.f32.partialorder %v1174_v58, 0.0  ;;  %v1182_v44 = vmul.f32 0.2, %v1174_v58  ;;  %vm1381_vm12 = vcmp.gt.f32.partialorder %v1377_v29, 0.0  ;;  %v1385_v52 = vmul.f32 0.2, %v1377_v29 }
 0x5e0   :  { %v1184_v39 = vsel %vm1176_vm3, %v1172_v11, %v1180_v31  ;;  %v1185_v43 = vsel %vm1177_vm10, %v1173_v42, %v1181_v28  ;;  %vm1179_vm14 = vcmp.gt.f32.partialorder %v1175_v49, 0.0  ;;  %v1183_v56 = vmul.f32 0.2, %v1175_v49 }
 0x5e1   :  { %v3463_v45 = vsel %vm106_vm8, %v1184_v39, -1e+30  ;;  %v3467_v26 = vsel %vm107_vm6, %v1185_v43, -1e+30  ;;  %v1186_v6 = vsel %vm1178_vm11, %v1174_v58, %v1182_v44  ;;  %v1389_v18 = vsel %vm1381_vm12, %v1377_v29, %v1385_v52 }
 0x5e2   :  { %v1192_v35 = vsel %vm317_vm7, %v3463_v45, -inf  ;;  %v1195_v16 = vsel %vm317_vm7, %v3467_v26, -inf  ;;  %v3475_v37 = vsel %vm108_vm9, %v1186_v6, -1e+30  ;;  %v3479_v30 = vsel %vm109_vm0, %v1389_v18, -1e+30 }
 0x5e3   :  { %1193 = vmax.xlane.f32.xlu0 %v1192_v35  ;;  %1196 = vmax.xlane.f32.xlu1 %v1195_v16  ;;  %vm1530_vm15 = vcmp.gt.f32.partialorder %v1526_v15, 0.0  ;;  %v1187_v17 = vsel %vm1179_vm14, %v1175_v49, %v1183_v56  ;;  %v1534_v20 = vmul.f32 0.2, %v1526_v15  ;;  %vm1084_vm1 = vcmp.gt.f32.partialorder %v1080_v24, 0.0 }
 0x5e4   :  { %v1088_v57 = vmul.f32 0.2, %v1080_v24  ;;  %vm1532_vm3 = vcmp.gt.f32.partialorder %v1528_v27, 0.0  ;;  %v1536_v36 = vmul.f32 0.2, %v1528_v27  ;;  %v1082_v61 = vadd.f32 %v3446_v60, %v3429_v40 }
 0x5e5   :  { %v1198_v46 = vsel %vm317_vm7, %v3475_v37, -inf  ;;  %v1403_v47 = vsel %vm317_vm7, %v3479_v30, -inf  ;;  %v1538_v38 = vsel %vm1530_vm15, %v1526_v15, %v1534_v20  ;;  %v3489_v59 = vsel %vm109_vm0, %v1187_v17, -1e+30 }
 0x5e6   :  { %v3493_v4 = vsel %vm107_vm6, %v1538_v38, -1e+30  ;;  %v1092_v2 = vsel %vm1084_vm1, %v1080_v24, %v1088_v57  ;;  %v1540_v48 = vsel %vm1532_vm3, %v1528_v27, %v1536_v36  ;;  %v1083_v40 = vadd.f32 %v3446_v60, %v3433_v1 }
 0x5e7   :  { %1199 = vmax.xlane.f32.xlu0 %v1198_v46  ;;  %1404 = vmax.xlane.f32.xlu1 %v1403_v47  ;;  %vm1086_vm10 = vcmp.gt.f32.partialorder %v1082_v61, 0.0  ;;  %v1090_v7 = vmul.f32 0.2, %v1082_v61  ;;  %v1201_v8 = vsel %vm317_vm7, %v3489_v59, -inf  ;;  %v1548_v9 = vsel %vm317_vm7, %v3493_v4, -inf }
 0x5e8   :  { %v3503_v10 = vsel %vm106_vm8, %v1092_v2, -1e+30  ;;  %v3507_v41 = vsel %vm109_vm0, %v1540_v48, -1e+30  ;;  %v1091_v1 = vmul.f32 0.2, %v1083_v40  ;;  %v1081_v11 = vadd.f32 %v3446_v60, %v3437_v0 }
 0x5e9   :  { %v1094_v14 = vsel %vm1086_vm10, %v1082_v61, %v1090_v7  ;;  %vm1087_vm11 = vcmp.gt.f32.partialorder %v1083_v40, 0.0  ;;  %v1100_v42 = vsel %vm317_vm7, %v3503_v10, -inf  ;;  %v1554_v58 = vsel %vm317_vm7, %v3507_v41, -inf }
 0x5ea   :  { %v3517_v29 = vsel %vm108_vm9, %v1094_v14, -1e+30  ;;  %v1095_v49 = vsel %vm1087_vm11, %v1083_v40, %v1091_v1  ;;  %v1089_v15 = vmul.f32 0.2, %v1081_v11  ;;  %v1374_v24 = vadd.f32 %v3451_v12, %v3439_v19 }
 0x5eb   :  { %1202 = vmax.xlane.f32.xlu0 %v1201_v8  ;;  %1549 = vmax.xlane.f32.xlu1 %v1548_v9  ;;  %vm1085_vm12 = vcmp.gt.f32.partialorder %v1081_v11, 0.0  ;;  %v1106_v0 = vsel %vm317_vm7, %v3517_v29, -inf  ;;  %v3525_v60 = vsel %vm109_vm0, %v1095_v49, -1e+30  ;;  %v1375_v28 = vadd.f32 %v3451_v12, %v3443_v33 }
 0x5ec   :  { %v1093_v27 = vsel %vm1085_vm12, %v1081_v11, %v1089_v15  ;;  %v1382_v31 = vmul.f32 0.2, %v1374_v24  ;;  %vm1378_vm14 = vcmp.gt.f32.partialorder %v1374_v24, 0.0  ;;  %v1109_v44 = vsel %vm317_vm7, %v3525_v60, -inf }
 0x5ed   :  { %v3533_v19 = vsel %vm107_vm6, %v1093_v27, -1e+30  ;;  %v1383_v39 = vmul.f32 0.2, %v1375_v28  ;;  %v1376_v43 = vadd.f32 %v3451_v12, %v3431_v21  ;;  %vm1379_vm15 = vcmp.gt.f32.partialorder %v1375_v28, 0.0 }
 0x5ee   :  { %v1386_v52 = vsel %vm1378_vm14, %v1374_v24, %v1382_v31  ;;  %v1103_v56 = vsel %vm317_vm7, %v3533_v19, -inf  ;;  %v1525_v35 = vadd.f32 %v3455_v25, %v3441_v3  ;;  %v1527_v20 = vadd.f32 %v3455_v25, %v3435_v34 }
 0x5ef   :  { %1101 = vmax.xlane.f32.xlu0 %v1100_v42  ;;  %1555 = vmax.xlane.f32.xlu1 %v1554_v58  ;;  %v3541_v33 = vsel %vm106_vm8, %v1386_v52, -1e+30  ;;  %v1387_v6 = vsel %vm1379_vm15, %v1375_v28, %v1383_v39  ;;  %v1384_v18 = vmul.f32 0.2, %v1376_v43  ;;  %vm1380_vm1 = vcmp.gt.f32.partialorder %v1376_v43, 0.0 }
 0x5f0   :  { %v1394_v16 = vsel %vm317_vm7, %v3541_v33, -inf  ;;  %v3549_v21 = vsel %vm107_vm6, %v1387_v6, -1e+30  ;;  %v1533_v17 = vmul.f32 0.2, %v1525_v35  ;;  %vm1529_vm3 = vcmp.gt.f32.partialorder %v1525_v35, 0.0 }
 0x5f1   :  { %v1388_v12 = vsel %vm1380_vm1, %v1376_v43, %v1384_v18  ;;  %v1397_v57 = vsel %vm317_vm7, %v3549_v21, -inf  ;;  %v1535_v61 = vmul.f32 0.2, %v1527_v20  ;;  %vm1531_vm10 = vcmp.gt.f32.partialorder %v1527_v20, 0.0 }
 0x5f2   :  { %v3557_v3 = vsel %vm108_vm9, %v1388_v12, -1e+30  ;;  %v1537_v36 = vsel %vm1529_vm3, %v1525_v35, %v1533_v17  ;;  %vm1908_vm11 = vcmp.lt.s32.totalorder %v3036_v13, 8 }
 0x5f3   :  { %1107 = vmax.xlane.f32.xlu0 %v1106_v0  ;;  %v1400_v46 = vsel %vm317_vm7, %v3557_v3, -inf  ;;  %v3563_v47 = vsel %vm106_vm8, %v1537_v36, -1e+30  ;;  %v1539_v34 = vsel %vm1531_vm10, %v1527_v20, %v1535_v61 }
 0x5f4   :  { %v1545_v25 = vsel %vm317_vm7, %v3563_v47, -inf  ;;  %v3569_v38 = vsel %vm108_vm9, %v1539_v34, -1e+30 }
 0x5f5   :  { %v1551_v2 = vsel %vm317_vm7, %v3569_v38, -inf }
 0x5f7   :  { %1110 = vmax.xlane.f32.xlu0 %v1109_v44 }
 0x5fb   :  { %1104 = vmax.xlane.f32.xlu0 %v1103_v56 }
 0x5ff   :  { %1395 = vmax.xlane.f32.xlu0 %v1394_v16 }
 0x603   :  { %1398 = vmax.xlane.f32.xlu0 %v1397_v57 }
 0x607   :  { %1401 = vmax.xlane.f32.xlu0 %v1400_v46 }
 0x60b   :  { %1546 = vmax.xlane.f32.xlu0 %v1545_v25 }
 0x60f   :  { %1552 = vmax.xlane.f32.xlu0 %v1551_v2 }
 0x66c   :  { %v1197_v48 = vpop.xlane.xlu1 %1196  ;;  %v1194_v40 = vpop.xlane.xlu0 %1193 }
 0x66d   :  { %v1205_v7 = vsub.f32 %v3467_v26, %v1197_v48  ;;  %v1204_v8 = vsub.f32 %v3463_v45, %v1194_v40 }
 0x66f   :  { %v1210_v9 = vmul.f32 1.442695, %v1205_v7  ;;  %v1208_v14 = vmul.f32 1.442695, %v1204_v8 }
 0x670   :  { %v1200_v1 = vpop.xlane.xlu0 %1199  ;;  %v1405_v39 = vpop.xlane.xlu1 %1404 }
 0x671   :  { %2704 = vpow2.f32 %v1210_v9  ;;  %v1206_v11 = vsub.f32 %v3475_v37, %v1200_v1  ;;  %v1409_v36 = vsub.f32 %v3479_v30, %v1405_v39 }
 0x672   :  { %2706 = vpow2.f32 %v1208_v14 }
 0x673   :  { %v1212_v42 = vmul.f32 1.442695, %v1206_v11  ;;  %v1416_v2 = vmul.f32 1.442695, %v1409_v36 }
 0x674   :  { %v1203_v58 = vpop.xlane.xlu0 %1202  ;;  %v1550_v20 = vpop.xlane.xlu1 %1549 }
 0x675   :  { %v1207_v49 = vsub.f32 %v3489_v59, %v1203_v58  ;;  %2708 = vpow2.f32 %v1212_v42 }
 0x677   :  { %v1214_v15 = vmul.f32 1.442695, %v1207_v49 }
 0x678   :  { %v1102_v24 = vpop.xlane.xlu0 %1101  ;;  %v1556_v30 = vpop.xlane.xlu1 %1555 }
 0x679   :  { %v1112_v0 = vsub.f32 %v3503_v10, %v1102_v24  ;;  %2710 = vpow2.f32 %v1214_v15  ;;  %v1560_v14 = vsub.f32 %v3507_v41, %v1556_v30 }
 0x67b   :  { %v1116_v26 = vmul.f32 1.442695, %v1112_v0  ;;  %v1567_v42 = vmul.f32 1.442695, %v1560_v14 }
 0x67c   :  { %v1108_v27 = vpop.xlane.xlu0 %1107 }
 0x67d   :  { %v1114_v45 = vsub.f32 %v3517_v29, %v1108_v27  ;;  %2712 = vpow2.f32 %v1116_v26 }
 0x67e   :  { %v3579_v31 = vpop.eup %2704 }
 0x67f   :  { %v3581_v28 = vpop.eup %2706  ;;  %v1120_v37 = vmul.f32 1.442695, %v1114_v45  ;;  %v1219_v44 = vsel %vm317_vm7, %v3579_v31, 0.0 }
 0x680   :  { %1220 = vadd.xlane.f32.xlu1 %v1219_v44  ;;  %v1216_v59 = vsel %vm317_vm7, %v3581_v28, 0.0  ;;  %v1111_v52 = vpop.xlane.xlu0 %1110 }
 0x681   :  { %2714 = vpow2.f32 %v1120_v37  ;;  %1217 = vadd.xlane.f32.xlu0 %v1216_v59  ;;  %v1115_v29 = vsub.f32 %v3525_v60, %v1111_v52 }
 0x682   :  { %v3587_v10 = vpop.eup %2708 }
 0x683   :  { %v1222_v43 = vsel %vm317_vm7, %v3587_v10, 0.0  ;;  %v1122_v35 = vmul.f32 1.442695, %v1115_v29 }
 0x684   :  { %v1105_v56 = vpop.xlane.xlu0 %1104 }
 0x685   :  { %1223 = vadd.xlane.f32.xlu0 %v1222_v43  ;;  %v1113_v6 = vsub.f32 %v3533_v19, %v1105_v56 }
 0x686   :  { %v3593_v18 = vpop.eup %2710 }
 0x687   :  { %v1118_v16 = vmul.f32 1.442695, %v1113_v6  ;;  %v1225_v12 = vsel %vm317_vm7, %v3593_v18, 0.0 }
 0x688   :  { %v1396_v17 = vpop.xlane.xlu0 %1395  ;;  %1226 = vadd.xlane.f32.xlu1 %v1225_v12 }
 0x689   :  { %2716 = vpow2.f32 %v1118_v16  ;;  %v1406_v60 = vsub.f32 %v3541_v33, %v1396_v17  ;;  %v1558_v33 = vsub.f32 %v3493_v4, %v1550_v20 }
 0x68a   :  { %v3598_v57 = vpop.eup %2712  ;;  %2718 = vpow2.f32 %v1122_v35 }
 0x68b   :  { %v1410_v61 = vmul.f32 1.442695, %v1406_v60  ;;  %v1124_v19 = vsel %vm317_vm7, %v3598_v57, 0.0  ;;  %v1563_v9 = vmul.f32 1.442695, %v1558_v33 }
 0x68c   :  { %v1399_v46 = vpop.xlane.xlu0 %1398  ;;  %1125 = vadd.xlane.f32.xlu0 %v1124_v19 }
 0x68d   :  { %2720 = vpow2.f32 %v1410_v61  ;;  %v1407_v34 = vsub.f32 %v3549_v21, %v1399_v46 }
 0x68e   :  { %v3604_v25 = vpop.eup %2714 }
 0x68f   :  { %v1412_v48 = vmul.f32 1.442695, %v1407_v34  ;;  %v1130_v40 = vsel %vm317_vm7, %v3604_v25, 0.0 }
 0x690   :  { %v1402_v7 = vpop.xlane.xlu0 %1401  ;;  %1131 = vadd.xlane.f32.xlu0 %v1130_v40 }
 0x691   :  { %2722 = vpow2.f32 %v1412_v48  ;;  %v1408_v8 = vsub.f32 %v3557_v3, %v1402_v7 }
 0x692   :  { %2724 = vpow2.f32 %v1416_v2 }
 0x693   :  { %v1414_v21 = vmul.f32 1.442695, %v1408_v8 }
 0x694   :  { %v1547_v1 = vpop.xlane.xlu0 %1546 }
 0x695   :  { %2726 = vpow2.f32 %v1414_v21  ;;  %v1557_v11 = vsub.f32 %v3563_v47, %v1547_v1 }
 0x696   :  { %v3612_v4 = vpop.eup %2716  ;;  %2728 = vpow2.f32 %v1563_v9 }
 0x697   :  { %v1561_v58 = vmul.f32 1.442695, %v1557_v11  ;;  %v1127_v49 = vsel %vm317_vm7, %v3612_v4, 0.0  ;;  %v3616_v15 = vpop.eup %2718 }
 0x698   :  { %1128 = vadd.xlane.f32.xlu1 %v1127_v49  ;;  %v1553_v3 = vpop.xlane.xlu0 %1552  ;;  %v1133_v47 = vsel %vm317_vm7, %v3616_v15, 0.0 }
 0x699   :  { %2730 = vpow2.f32 %v1561_v58  ;;  %v1559_v41 = vsub.f32 %v3569_v38, %v1553_v3 }
 0x69a   :  { %v3619_v24 = vpop.eup %2720  ;;  %2732 = vpow2.f32 %v1567_v42 }
 0x69b   :  { %v1565_v0 = vmul.f32 1.442695, %v1559_v41  ;;  %v1418_v26 = vsel %vm317_vm7, %v3619_v24, 0.0 }
 0x69c   :  { %1134 = vadd.xlane.f32.xlu1 %v1133_v47  ;;  %1419 = vadd.xlane.f32.xlu0 %v1418_v26 }
 0x69d   :  { %2734 = vpow2.f32 %v1565_v0 }
 0x69e   :  { %v3625_v27 = vpop.eup %2722 }
 0x69f   :  { %v1421_v45 = vsel %vm317_vm7, %v3625_v27, 0.0  ;;  %v3629_v37 = vpop.eup %2724 }
 0x6a0   :  { %1422 = vadd.xlane.f32.xlu1 %v1421_v45  ;;  %v1427_v44 = vsel %vm317_vm7, %v3629_v37, 0.0 }
 0x6a2   :  { %v3631_v38 = vpop.eup %2726 }
 0x6a3   :  { %v1424_v59 = vsel %vm317_vm7, %v3631_v38, 0.0  ;;  %v3637_v52 = vpop.eup %2728 }
 0x6a4   :  { %1428 = vadd.xlane.f32.xlu1 %v1427_v44  ;;  %1425 = vadd.xlane.f32.xlu0 %v1424_v59  ;;  %v1572_v39 = vsel %vm317_vm7, %v3637_v52, 0.0 }
 0x6a6   :  { %v3639_v29 = vpop.eup %2730 }
 0x6a7   :  { %v1569_v43 = vsel %vm317_vm7, %v3639_v29, 0.0  ;;  %v3645_v56 = vpop.eup %2732 }
 0x6a8   :  { %1573 = vadd.xlane.f32.xlu1 %v1572_v39  ;;  %1570 = vadd.xlane.f32.xlu0 %v1569_v43  ;;  %v1578_v35 = vsel %vm317_vm7, %v3645_v56, 0.0 }
 0x6aa   :  { %v3647_v6 = vpop.eup %2734 }
 0x6ab   :  { %v1575_v16 = vsel %vm317_vm7, %v3647_v6, 0.0 }
 0x6ac   :  { %1579 = vadd.xlane.f32.xlu1 %v1578_v35  ;;  %1576 = vadd.xlane.f32.xlu0 %v1575_v16 }
 0x709   :  { %v1221_v12 = vpop.xlane.xlu1 %1220 }
 0x70a   :  { %2736 = vrcp.f32 %v1221_v12  ;;  %v1218_v17 = vpop.xlane.xlu0 %1217 }
 0x70b   :  { %2738 = vrcp.f32 %v1218_v17 }
 0x70e   :  { %v1224_v60 = vpop.xlane.xlu0 %1223 }
 0x70f   :  { %2740 = vrcp.f32 %v1224_v60 }
 0x711   :  { %v1227_v20 = vpop.xlane.xlu1 %1226 }
 0x712   :  { %2742 = vrcp.f32 %v1227_v20 }
 0x715   :  { %v1126_v34 = vpop.xlane.xlu0 %1125 }
 0x716   :  { %2744 = vrcp.f32 %v1126_v34 }
 0x717   :  { %v2737_v36 = vpop.eup %2736 }
 0x718   :  { %v2739_v61 = vpop.eup %2738  ;;  %v1233_v19 = vmul.f32 %v2737_v36, %v3579_v31  ;;  %v2633_v36 = vld [vmem:[#allocation10 + $0x30] sm:$0xff]  }
 0x719   :  { %v1232_v46 = vmul.f32 %v2739_v61, %v3581_v28  ;;  %v1132_v40 = vpop.xlane.xlu0 %1131  ;;  %v2634_v61 = vld [vmem:[#allocation10 + $0x28] sm:$0xff]  }
 0x71b   :  { %v1236_v2 = vpack.c.bf16 %v1233_v19, %v1232_v46  ;;  %v2639_v19 = vld [vmem:[#allocation10] sm:$0xff]   ;;  %v2955_v46 = vmov 19  }
 0x71c   :  { %v2741_v33 = vpop.eup %2740  ;;  %2609 = vset.pattern.permute.xlu1 %v2955_v46  ;;  %2610 = vset.pattern.permute.xlu0 %v2955_v46 }
 0x71d   :  { %2496 = vmatprep.mubr.msk.bf16.mxu1 %vm317_vm7, %v1236_v2  ;;  %v1234_v7 = vmul.f32 %v2741_v33, %v3587_v10 }
 0x71f   :  { %v2743_v48 = vpop.eup %2742 }
 0x720   :  { %v1235_v8 = vmul.f32 %v2743_v48, %v3593_v18 }
 0x721   :  { %v1129_v30 = vpop.xlane.xlu1 %1128 }
 0x722   :  { %2746 = vrcp.f32 %v1129_v30  ;;  %v1237_v9 = vpack.c.bf16 %v1235_v8, %v1234_v7 }
 0x723   :  { %2748 = vrcp.f32 %v1132_v40  ;;  %v2745_v18 = vpop.eup %2744 }
 0x724   :  { %2497 = vmatmul.mubr.msk.bf16.vlgmr.msra.gmra.mxu1 %vm317_vm7, %v1237_v9  ;;  %v1140_v11 = vmul.f32 %v2745_v18, %v3598_v57 }
 0x725   :  { %v1135_v31 = vpop.xlane.xlu1 %1134  ;;  %v1420_v28 = vpop.xlane.xlu0 %1419  ;;  %2501 = vmatpush3.bf16.msk.msra.mxu1 %vm3065_vm5, %v3397_v63 }
 0x726   :  { %2750 = vrcp.f32 %v1135_v31  ;;  %2502 = vmatprep.subr.msk.bf16.mxu1 %vm3065_vm5, %v3401_v22 }
 0x727   :  { %2752 = vrcp.f32 %v1420_v28 }
 0x729   :  { %v1423_v10 = vpop.xlane.xlu1 %1422  ;;  %2503 = vmatpush3.bf16.msk.msra.mxu1 %vm3065_vm5, %v3401_v22  ;;  %vm2004_vm5 = vcmp.ge.s32.totalorder %v3036_v13, 8 }
 0x72a   :  { %2754 = vrcp.f32 %v1423_v10  ;;  %2508 = vmatprep.subr.msk.bf16.mxu1 %vm3339_vm13, %v3397_v63 }
 0x72d   :  { %v1429_v14 = vpop.xlane.xlu1 %1428  ;;  %v1426_v21 = vpop.xlane.xlu0 %1425 }
 0x72e   :  { %2756 = vrcp.f32 %v1429_v14 }
 0x72f   :  { %v2747_v1 = vpop.eup %2746  ;;  %2758 = vrcp.f32 %v1426_v21 }
 0x730   :  { %v1141_v42 = vmul.f32 %v2747_v1, %v3612_v4  ;;  %v2749_v58 = vpop.eup %2748 }
 0x731   :  { %v1574_v49 = vpop.xlane.xlu1 %1573  ;;  %v1571_v3 = vpop.xlane.xlu0 %1570  ;;  %v1142_v0 = vmul.f32 %v2749_v58, %v3604_v25 }
 0x732   :  { %2760 = vrcp.f32 %v1574_v49  ;;  %v1144_v23 = vpack.c.bf16 %v1141_v42, %v1140_v11 }
 0x733   :  { %v2751_v41 = vpop.eup %2750  ;;  %2762 = vrcp.f32 %v1571_v3 }
 0x734   :  { %2504 = vmatprep.mubr.msk.bf16.mxu1 %vm317_vm7, %v1144_v23  ;;  %v1143_v47 = vmul.f32 %v2751_v41, %v3616_v15  ;;  %v2753_v26 = vpop.eup %2752 }
 0x735   :  { %v1580_v45 = vpop.xlane.xlu1 %1579  ;;  %v1577_v44 = vpop.xlane.xlu0 %1576  ;;  %v1434_v4 = vmul.f32 %v2753_v26, %v3619_v24  ;;  %v2324_v26 = vld [vmem:[%s3826_s5] ss:$0 sm:$0xff]  ;;  %s2957_s5 = smov 120  }
 0x736   :  { %2764 = vrcp.f32 %v1580_v45  ;;  %v1145_v57 = vpack.c.bf16 %v1143_v47, %v1142_v0 }
 0x737   :  { %v2755_v59 = vpop.eup %2754  ;;  %2766 = vrcp.f32 %v1577_v44 }
 0x738   :  { %2505 = vmatmul.mubr.msk.bf16.vlgmr.msra.gmra.mxu1 %vm317_vm7, %v1145_v57  ;;  %v1435_v39 = vmul.f32 %v2755_v59, %v3625_v27 }
 0x739   :  { %2509 = vmatpush3.bf16.msk.msra.mxu1 %vm3339_vm13, %v3397_v63 }
 0x73a   :  { %2510 = vmatprep.subr.msk.bf16.mxu1 %vm3339_vm13, %v3401_v22  ;;  %v1438_v25 = vpack.c.bf16 %v1435_v39, %v1434_v4 }
 0x73b   :  { %v2757_v15 = vpop.eup %2756 }
 0x73c   :  { %v2759_v43 = vpop.eup %2758  ;;  %2512 = vmatprep.mubr.msk.bf16.mxu1 %vm317_vm7, %v1438_v25  ;;  %v1437_v35 = vmul.f32 %v2757_v15, %v3629_v37 }
 0x73d   :  { %2511 = vmatpush3.bf16.msk.msra.mxu1 %vm3339_vm13, %v3401_v22  ;;  %v1436_v24 = vmul.f32 %v2759_v43, %v3631_v38  ;;  %vm2005_vm13 = vmand %vm2004_vm5, %vm365_vm4 }
 0x73e   :  { %2516 = vmatprep.subr.msk.bf16.mxu1 %vm3365_vm2, %v3397_v63  ;;  %vm3730_vm4 = vmpackc.low %vm1908_vm11, %vm1908_vm11 }
 0x73f   :  { %v2761_v27 = vpop.eup %2760  ;;  %v1439_v16 = vpack.c.bf16 %v1437_v35, %v1436_v24 }
 0x740   :  { %v2763_v12 = vpop.eup %2762  ;;  %v1586_v17 = vmul.f32 %v2761_v27, %v3637_v52 }
 0x741   :  { %2513 = vmatmul.mubr.msk.bf16.vlgmr.msra.gmra.mxu1 %vm317_vm7, %v1439_v16  ;;  %v1585_v60 = vmul.f32 %v2763_v12, %v3639_v29 }
 0x742   :  { %2517 = vmatpush3.bf16.msk.msra.mxu1 %vm3365_vm2, %v3397_v63  ;;  %v2632_v63 = vld [vmem:[#allocation10 + $0x38] sm:$0xff]  }
 0x743   :  { %v2765_v62 = vpop.eup %2764  ;;  %2518 = vmatprep.subr.msk.bf16.mxu1 %vm3365_vm2, %v3401_v22  ;;  %v1589_v37 = vpack.c.bf16 %v1586_v17, %v1585_v60  ;;  %2524 = vmatprep.subr.bf16.mxu0 %v2632_v63 }
 0x744   :  { %v2767_v38 = vpop.eup %2766  ;;  %v1588_v20 = vmul.f32 %v2765_v62, %v3645_v56  ;;  %2525 = vmatpush3.bf16.msra.mxu0 %v2632_v63  ;;  %v2635_v56 = vld [vmem:[#allocation10 + $0x20] sm:$0xff]  }
 0x745   :  { %2520 = vmatprep.mubr.msk.bf16.mxu1 %vm317_vm7, %v1589_v37  ;;  %v1587_v52 = vmul.f32 %v2767_v38, %v3647_v6  ;;  %2526 = vmatprep.subr.bf16.mxu0 %v2633_v36  ;;  %v2636_v6 = vld [vmem:[#allocation10 + $0x18] sm:$0xff]   ;;  %v2956_v37 = vmov 18  }
 0x746   :  { %2519 = vmatpush3.bf16.msk.msra.mxu1 %vm3365_vm2, %v3401_v22  ;;  %v2638_v22 = vld [vmem:[#allocation10 + $0x8] sm:$0xff]   ;;  %vm2333_vm2 = vmpackc.low %vm2005_vm13, %vm2005_vm13 }
 0x747   :  { %v1590_v29 = vpack.c.bf16 %v1588_v20, %v1587_v52 }
 0x748   :  { %2527 = vmatpush3.bf16.msra.mxu0 %v2633_v36 }
 0x749   :  { %2521 = vmatmul.mubr.msk.bf16.vlgmr.msra.gmra.mxu1 %vm317_vm7, %v1590_v29  ;;  %2528 = vmatprep.subr.bf16.mxu0 %v2634_v61 }
 0x74c   :  { %2529 = vmatpush3.bf16.msra.mxu0 %v2634_v61 }
 0x74d   :  { %2530 = vmatprep.subr.bf16.mxu0 %v2635_v56 }
 0x750   :  { %2531 = vmatpush3.bf16.msra.mxu0 %v2635_v56 }
 0x751   :  { %2532 = vmatprep.subr.bf16.mxu0 %v2636_v6 }
 0x754   :  { %2533 = vmatpush3.bf16.msra.mxu0 %v2636_v6 }
 0x755   :  { %2534 = vmatprep.subr.bf16.mxu0 %v2637_v32 }
 0x758   :  { %2535 = vmatpush3.bf16.msra.mxu0 %v2637_v32 }
 0x759   :  { %2536 = vmatprep.subr.bf16.mxu0 %v2638_v22 }
 0x75c   :  { %2537 = vmatpush3.bf16.msra.mxu0 %v2638_v22 }
 0x75d   :  { %2538 = vmatprep.subr.bf16.mxu0 %v2639_v19 }
 0x760   :  { %2539 = vmatpush3.bf16.msra.mxu0 %v2639_v19 }
 0x7e4   :  { %v2498_v34 = vpop.f32.mrf.mxu1 }
 0x7e6   :  { %v1284_v2 = vpop.f32.mrf.mxu1 }
 0x7e8   :  { %v2499_v33 = vpop.f32.mrf.mxu1 }
 0x7ea   :  { %v1287_v48 = vpop.f32.mrf.mxu1 }
 0x7f8   :  { %v2506_v40 = vpop.f32.mrf.mxu1 }
 0x7f9   :  { %v1348_v14 = vadd.f32 %v2506_v40, %v2498_v34 }
 0x7fa   :  { %v1339_v30 = vpop.f32.mrf.mxu1 }
 0x7fb   :  { %v1340_v18 = vadd.f32 %v1339_v30, %v1284_v2 }
 0x7fc   :  { %v2507_v7 = vpop.f32.mrf.mxu1 }
 0x7fd   :  { %v1351_v1 = vadd.f32 %v2507_v7, %v2499_v33 }
 0x7fe   :  { %v1342_v8 = vpop.f32.mrf.mxu1 }
 0x7ff   :  { %v1343_v49 = vadd.f32 %v1342_v8, %v1287_v48 }
 0x801   :  { %v2514_v9 = vpop.f32.mrf.mxu1 }
 0x802   :  { %v1503_v42 = vadd.f32 %v2514_v9, %v1348_v14 }
 0x803   :  { %v1486_v31 = vpop.f32.mrf.mxu1 }
 0x804   :  { %v1501_v11 = vadd.f32 %v1486_v31, %v1340_v18 }
 0x805   :  { %v2515_v28 = vpop.f32.mrf.mxu1 }
 0x806   :  { %v1504_v3 = vadd.f32 %v2515_v28, %v1351_v1 }
 0x807   :  { %v1489_v10 = vpop.f32.mrf.mxu1 }
 0x808   :  { %v1502_v47 = vadd.f32 %v1489_v10, %v1343_v49 }
 0x809   :  { %v2522_v21 = vpop.f32.mrf.mxu1 }
 0x80a   :  { %v1654_v41 = vadd.f32 %v2522_v21, %v1503_v42 }
 0x80b   :  { %v1637_v58 = vpop.f32.mrf.mxu1 }
 0x80c   :  { %v1652_v23 = vadd.f32 %v1637_v58, %v1501_v11  ;;  %v1665_v39 = vadd.f32 %v2324_v26, %v1654_v41 }
 0x80d   :  { %v2523_v0 = vpop.f32.mrf.mxu1 }
 0x80e   :  { %v1655_v45 = vadd.f32 %v2523_v0, %v1504_v3  ;;  %v1663_v57 = vadd.f32 %v2324_v26, %v1652_v23  ;;  %v1669_v24 = vmax.f32 %v1665_v39, 0.0 }
 0x80f   :  { %v1640_v44 = vpop.f32.mrf.mxu1 }
 0x810   :  { %v1666_v59 = vadd.f32 %v2324_v26, %v1655_v45  ;;  %v1653_v4 = vadd.f32 %v1640_v44, %v1502_v47  ;;  %v1667_v43 = vmax.f32 %v1663_v57, 0.0 }
 0x812   :  { %v1664_v25 = vadd.f32 %v2324_v26, %v1653_v4  ;;  %v1670_v15 = vmax.f32 %v1666_v59, 0.0 }
 0x814   :  { %v1668_v35 = vmax.f32 %v1664_v25, 0.0  ;;  %v1672_v16 = vpack.c.bf16 %v1670_v15, %v1669_v24 }
 0x816   :  { %v1671_v27 = vpack.c.bf16 %v1668_v35, %v1667_v43 }
 0x818   :  { %2540 = vmatprep.mubr.bf16.mxu0 %v1671_v27 }
 0x819   :  { %2541 = vmatmul.mubr.bf16.vlgmr.msra.gmra.mxu0 %v1672_v16 }
 0x8d9   :  { %v2542_v12 = vpop.f32.mrf.mxu0 }
 0x8da   :  { %1927 = vperm.xlu1 %2609, %v2542_v12  }
 0x8db   :  { %v1771_v17 = vpop.f32.mrf.mxu0 }
 0x8dc   :  { %1919 = vperm.xlu0 %2610, %v1771_v17  }
 0x8dd   :  { %v2543_v60 = vpop.f32.mrf.mxu0 }
 0x8de   :  { %v3718_v62 = vpack.c.bf16 %v2543_v60, %v2542_v12  ;;  %2611 = vset.pattern.permute.xlu1 %v2956_v37 }
 0x8df   :  { %1820 = vperm.xlu1 %2611, %v1771_v17   ;;  %v1774_v38 = vpop.f32.mrf.mxu0 }
 0x8e0   :  { %v3720_v20 = vpack.c.bf16 %v1774_v38, %v1771_v17  ;;  %2544 = vmatprep.subr.msk.bf16.mxu1 %vm2333_vm2, %v3718_v62 }
 0x8e1   :  { %2545 = vmatpush3.bf16.msk.msra.mxu1 %vm2333_vm2, %v3718_v62 }
 0x8e2   :  { %2546 = vmatprep.subr.msk.bf16.mxu1 %vm2333_vm2, %v3720_v20 }
 0x8e3   :  { %2612 = vset.pattern.permute.xlu1 %v2955_v46 }
 0x8e4   :  { %1931 = vperm.xlu1 %2612, %v2543_v60  }
 0x8e5   :  { %2547 = vmatpush3.bf16.msk.msra.mxu1 %vm2333_vm2, %v3720_v20 }
 0x8e6   :  { %2552 = vmatprep.subr.msk.bf16.mxu1 %vm3730_vm4, %v3718_v62 }
 0x8e8   :  { %1923 = vperm.xlu1 %2612, %v1774_v38  }
 0x8ec   :  { %2613 = vset.pattern.permute.xlu1 %v2956_v37 }
 0x8ed   :  { %1830 = vperm.xlu1 %2613, %v2542_v12  }
 0x8f1   :  { %1825 = vperm.xlu1 %2613, %v1774_v38  }
 0x8f5   :  { %1835 = vperm.xlu1 %2613, %v2543_v60  }
 0x8fa   :  { %1786 = vxpose.xlu0.b32.start [1/4] (short) (narrow) %v1771_v17, 24 }
 0x8fe   :  { %1787 = vxpose.xlu0.b32.cont [2/4] (short) (narrow) %v1774_v38, 24 }
 0x902   :  { %1788 = vxpose.xlu0.b32.cont [3/4] (short) (narrow) %v2542_v12, 24 }
 0x906   :  { %1789 = vxpose.xlu0.b32.end [4/4] (short) (narrow) %v2543_v60, 24 }
 0x955   :  { %v1928_v29 = vpop.permute.xlu1 %1927 }
 0x957   :  { %v1920_v63 = vpop.permute.xlu0 %1919 }
 0x95a   :  { %v1821_v36 = vpop.permute.xlu1 %1820 }
 0x95f   :  { %v1932_v56 = vpop.permute.xlu1 %1931 }
 0x963   :  { %v1924_v32 = vpop.permute.xlu1 %1923 }
 0x968   :  { %v1831_v7 = vpop.permute.xlu1 %1830 }
 0x96c   :  { %v1826_v49 = vpop.permute.xlu1 %1825 }
 0x970   :  { %v1836_v45 = vpop.permute.xlu1 %1835 }
 0x976   :  { %v1802_v61 = vpop.trf.xlu0 }
 0x97a   :  { %v1803_v6 = vpop.trf.xlu0 }
 0x97e   :  { %v1804_v22 = vpop.trf.xlu0 }
 0x97f   :  { %v1841_v19 = vrot.slane %v1804_v22, %v3105_v50  ;;  %v1937_v46 = vrot.slane %v1804_v22, %v3108_v51 }
 0x981   :  { %v1941_v34 = vadd.f32 %v1937_v46, %v1932_v56  ;;  %v1940_v2 = vadd.f32 %v1937_v46, %v1928_v29  ;;  %v1938_v33 = vadd.f32 %v1937_v46, %v1920_v63  ;;  %v1842_v48 = vadd.f32 %v1841_v19, %v1821_v36 }
 0x982   :  { %v1939_v10 = vadd.f32 %v1937_v46, %v1924_v32  ;;  %v1844_v58 = vadd.f32 %v1841_v19, %v1831_v7  ;;  %v1843_v47 = vadd.f32 %v1841_v19, %v1826_v49  ;;  %v1845_v4 = vadd.f32 %v1841_v19, %v1836_v45 }
 0x983   :  { %vm1945_vm12 = vcmp.gt.f32.partialorder %v1941_v34, 0.0  ;;  %v1949_v40 = vmul.f32 0.2, %v1941_v34  ;;  %vm1944_vm14 = vcmp.gt.f32.partialorder %v1940_v2, 0.0  ;;  %v1948_v30 = vmul.f32 0.2, %v1940_v2 }
 0x984   :  { %vm1942_vm15 = vcmp.gt.f32.partialorder %v1938_v33, 0.0  ;;  %v1946_v8 = vmul.f32 0.2, %v1938_v33  ;;  %v1850_v28 = vmul.f32 0.2, %v1842_v48  ;;  %vm1846_vm1 = vcmp.gt.f32.partialorder %v1842_v48, 0.0 }
 0x985   :  { %v1953_v9 = vsel %vm1945_vm12, %v1941_v34, %v1949_v40  ;;  %v1952_v31 = vsel %vm1944_vm14, %v1940_v2, %v1948_v30  ;;  %v1947_v42 = vmul.f32 0.2, %v1939_v10  ;;  %vm1943_vm3 = vcmp.gt.f32.partialorder %v1939_v10, 0.0 }
 0x986   :  { %v1957_v50 = vsel %vm109_vm0, %v1953_v9, -1e+30  ;;  %v1956_v51 = vsel %vm108_vm9, %v1952_v31, -1e+30  ;;  %v1950_v18 = vsel %vm1942_vm15, %v1938_v33, %v1946_v8  ;;  %v1854_v11 = vsel %vm1846_vm1, %v1842_v48, %v1850_v28 }
 0x987   :  { %v1967_v14 = vsel %vm317_vm7, %v1957_v50, -inf  ;;  %v1964_v21 = vsel %vm317_vm7, %v1956_v51, -inf  ;;  %v1954_v1 = vsel %vm106_vm8, %v1950_v18, -1e+30  ;;  %v1858_v23 = vsel %vm106_vm8, %v1854_v11, -1e+30 }
 0x988   :  { %1968 = vmax.xlane.f32.xlu0 %v1967_v14  ;;  %1965 = vmax.xlane.f32.xlu1 %v1964_v21  ;;  %v1958_v3 = vsel %vm317_vm7, %v1954_v1, -inf  ;;  %v1951_v41 = vsel %vm1943_vm3, %v1939_v10, %v1947_v42  ;;  %v1852_v0 = vmul.f32 0.2, %v1844_v58  ;;  %vm1848_vm10 = vcmp.gt.f32.partialorder %v1844_v58, 0.0 }
 0x989   :  { %v1862_v26 = vsel %vm317_vm7, %v1858_v23, -inf  ;;  %v1955_v44 = vsel %vm107_vm6, %v1951_v41, -1e+30  ;;  %v1851_v59 = vmul.f32 0.2, %v1843_v47  ;;  %vm1847_vm5 = vcmp.gt.f32.partialorder %v1843_v47, 0.0 }
 0x98a   :  { %v1856_v57 = vsel %vm1848_vm10, %v1844_v58, %v1852_v0  ;;  %v1961_v39 = vsel %vm317_vm7, %v1955_v44, -inf  ;;  %v1853_v15 = vmul.f32 0.2, %v1845_v4  ;;  %vm1849_vm8 = vcmp.gt.f32.partialorder %v1845_v4, 0.0 }
 0x98b   :  { %v1860_v54 = vsel %vm108_vm9, %v1856_v57, -1e+30  ;;  %v1855_v25 = vsel %vm1847_vm5, %v1843_v47, %v1851_v59 }
 0x98c   :  { %1959 = vmax.xlane.f32.xlu1 %v1958_v3  ;;  %v1868_v43 = vsel %vm317_vm7, %v1860_v54, -inf  ;;  %v1859_v35 = vsel %vm107_vm6, %v1855_v25, -1e+30  ;;  %v1857_v24 = vsel %vm1849_vm8, %v1845_v4, %v1853_v15  ;;  %vm2148_vm6 = vcmask 64512  }
 0x98d   :  { %v1865_v27 = vsel %vm317_vm7, %v1859_v35, -inf  ;;  %v1861_v16 = vsel %vm109_vm0, %v1857_v24, -1e+30 }
 0x98e   :  { %v1871_v12 = vsel %vm317_vm7, %v1861_v16, -inf }
 0x990   :  { %1863 = vmax.xlane.f32.xlu1 %v1862_v26 }
 0x994   :  { %1962 = vmax.xlane.f32.xlu1 %v1961_v39 }
 0x998   :  { %1869 = vmax.xlane.f32.xlu1 %v1868_v43 }
 0x99c   :  { %1866 = vmax.xlane.f32.xlu1 %v1865_v27 }
 0x9a0   :  { %1872 = vmax.xlane.f32.xlu1 %v1871_v12 }
 0xa11   :  { %v1966_v55 = vpop.xlane.xlu1 %1965  ;;  %v1969_v17 = vpop.xlane.xlu0 %1968 }
 0xa12   :  { %v1972_v60 = vsub.f32 %v1956_v51, %v1966_v55  ;;  %v1973_v38 = vsub.f32 %v1957_v50, %v1969_v17 }
 0xa14   :  { %v1978_v37 = vmul.f32 1.442695, %v1972_v60  ;;  %v1980_v36 = vmul.f32 1.442695, %v1973_v38 }
 0xa15   :  { %v1960_v29 = vpop.xlane.xlu1 %1959 }
 0xa16   :  { %v1970_v63 = vsub.f32 %v1954_v1, %v1960_v29  ;;  %2768 = vpow2.f32 %v1978_v37 }
 0xa18   :  { %v1974_v53 = vmul.f32 1.442695, %v1970_v63 }
 0xa19   :  { %v1864_v61 = vpop.xlane.xlu1 %1863 }
 0xa1a   :  { %2770 = vpow2.f32 %v1974_v53  ;;  %v1874_v56 = vsub.f32 %v1858_v23, %v1864_v61 }
 0xa1b   :  { %2772 = vpow2.f32 %v1980_v36 }
 0xa1c   :  { %v1878_v22 = vmul.f32 1.442695, %v1874_v56 }
 0xa1d   :  { %v1963_v6 = vpop.xlane.xlu1 %1962 }
 0xa1e   :  { %v1971_v5 = vsub.f32 %v1955_v44, %v1963_v6 }
 0xa20   :  { %v1976_v32 = vmul.f32 1.442695, %v1971_v5 }
 0xa21   :  { %v1870_v19 = vpop.xlane.xlu1 %1869 }
 0xa22   :  { %2774 = vpow2.f32 %v1976_v32  ;;  %v1876_v34 = vsub.f32 %v1860_v54, %v1870_v19 }
 0xa23   :  { %v2769_v46 = vpop.eup %2768  ;;  %2776 = vpow2.f32 %v1878_v22 }
 0xa24   :  { %v1988_v2 = vsel %vm317_vm7, %v2769_v46, 0.0  ;;  %v1882_v8 = vmul.f32 1.442695, %v1876_v34 }
 0xa25   :  { %v1867_v33 = vpop.xlane.xlu1 %1866  ;;  %1989 = vadd.xlane.f32.xlu1 %v1988_v2 }
 0xa26   :  { %v1875_v48 = vsub.f32 %v1859_v35, %v1867_v33  ;;  %v2349_v33 = vld [vmem:[%s3828_s7] ss:$0 sm:$0xff]  ;;  %s2958_s7 = smov [#allocation11]  }
 0xa27   :  { %v2771_v40 = vpop.eup %2770  ;;  %s2227_s10 = sshll.u32 %s2958_s7, 4  ;;  %s2228_s10 = int_to_ptr.vmem [resolvable:$true] %s2227_s10 }
 0xa28   :  { %v1880_v30 = vmul.f32 1.442695, %v1875_v48  ;;  %v1982_v7 = vsel %vm317_vm7, %v2771_v40, 0.0  ;;  %v2773_v31 = vpop.eup %2772  ;;  %s2916_s11 = scalar_lea.vmem %s2228_s10, 512  ;;  %p2921_p12 = scmp.lt.s32.totalorder %s2228_s10, %s2228_s10 }
 0xa29   :  { %v1873_v9 = vpop.xlane.xlu1 %1872  ;;  %1983 = vadd.xlane.f32.xlu1 %v1982_v7  ;;  %v1991_v50 = vsel %vm317_vm7, %v2773_v31, 0.0  ;;  %p2917_p11 = scmp.ne.s32.totalorder %s2228_s10, %s2916_s11  ;;  %p2922_p13 = scmp.lt.s32.totalorder %s2916_s11, %s2916_s11 }
 0xa2a   :  { %2778 = vpow2.f32 %v1880_v30  ;;  %v1877_v28 = vsub.f32 %v1861_v16, %v1873_v9 }
 0xa2b   :  { %2780 = vpow2.f32 %v1882_v8  ;;  %p2923_p0 = por %p2922_p13, %p2921_p12 }
 0xa2c   :  { %v1884_v10 = vmul.f32 1.442695, %v1877_v28 }
 0xa2d   :  { %1992 = vadd.xlane.f32.xlu1 %v1991_v50  ;;  %p2924_p1 = pnand %p2923_p0, %p2917_p11 }
 0xa2e   :  { %2782 = vpow2.f32 %v1884_v10 }
 0xa2f   :  { %v2775_v51 = vpop.eup %2774 }
 0xa30   :  { %v1985_v18 = vsel %vm317_vm7, %v2775_v51, 0.0  ;;  %v2777_v14 = vpop.eup %2776 }
 0xa31   :  { %1986 = vadd.xlane.f32.xlu1 %v1985_v18  ;;  %v1886_v21 = vsel %vm317_vm7, %v2777_v14, 0.0 }
 0xa35   :  { %1887 = vadd.xlane.f32.xlu1 %v1886_v21 }
 0xa37   :  { %v2779_v1 = vpop.eup %2778 }
 0xa38   :  { %v1889_v11 = vsel %vm317_vm7, %v2779_v1, 0.0  ;;  %v2781_v42 = vpop.eup %2780 }
 0xa39   :  { %1890 = vadd.xlane.f32.xlu1 %v1889_v11  ;;  %v1892_v3 = vsel %vm317_vm7, %v2781_v42, 0.0 }
 0xa3b   :  { %v2783_v58 = vpop.eup %2782 }
 0xa3c   :  { %v1895_v49 = vsel %vm317_vm7, %v2783_v58, 0.0 }
 0xa3d   :  { %1896 = vadd.xlane.f32.xlu0 %v1895_v49  ;;  %1893 = vadd.xlane.f32.xlu1 %v1892_v3 }
 0xaae   :  { %v1990_v23 = vpop.xlane.xlu1 %1989 }
 0xab2   :  { %v1984_v41 = vpop.xlane.xlu1 %1983 }
 0xab6   :  { %v1993_v0 = vpop.xlane.xlu1 %1992 }
 0xab7   :  { %2784 = vrcp.f32 %v1993_v0 }
 0xab8   :  { %2786 = vrcp.f32 %v1984_v41 }
 0xab9   :  { %2788 = vrcp.f32 %v1990_v23 }
 0xaba   :  { %v1987_v47 = vpop.xlane.xlu1 %1986 }
 0xabb   :  { %2790 = vrcp.f32 %v1987_v47 }
 0xabe   :  { %v1888_v26 = vpop.xlane.xlu1 %1887 }
 0xabf   :  { %2792 = vrcp.f32 %v1888_v26 }
 0xac2   :  { %v1891_v45 = vpop.xlane.xlu1 %1890 }
 0xac3   :  { %2794 = vrcp.f32 %v1891_v45 }
 0xac4   :  { %v2785_v44 = vpop.eup %2784 }
 0xac5   :  { %v2787_v59 = vpop.eup %2786  ;;  %v2001_v25 = vmul.f32 %v2785_v44, %v2773_v31 }
 0xac6   :  { %v1897_v57 = vpop.xlane.xlu0 %1896  ;;  %v1894_v4 = vpop.xlane.xlu1 %1893  ;;  %v1998_v15 = vmul.f32 %v2787_v59, %v2771_v40 }
 0xac7   :  { %2796 = vrcp.f32 %v1897_v57  ;;  %v2789_v39 = vpop.eup %2788 }
 0xac8   :  { %2798 = vrcp.f32 %v1894_v4  ;;  %v2791_v54 = vpop.eup %2790  ;;  %v2000_v35 = vmul.f32 %v2789_v39, %v2769_v46 }
 0xac9   :  { %v1999_v43 = vmul.f32 %v2791_v54, %v2775_v51 }
 0xaca   :  { %v2003_v27 = vpack.c.bf16 %v2001_v25, %v2000_v35 }
 0xacb   :  { %v2002_v24 = vpack.c.bf16 %v1999_v43, %v1998_v15 }
 0xacc   :  { %v2793_v16 = vpop.eup %2792 }
 0xacd   :  { %2548 = vmatprep.mubr.msk.bf16.mxu1 %vm317_vm7, %v2002_v24  ;;  %v1902_v55 = vmul.f32 %v2793_v16, %v2777_v14 }
 0xace   :  { %2549 = vmatmul.mubr.msk.bf16.vlgmr.msra.gmra.mxu1 %vm317_vm7, %v2003_v27 }
 0xacf   :  { %2553 = vmatpush3.bf16.msk.msra.mxu1 %vm3730_vm4, %v3718_v62 }
 0xad0   :  { %v2795_v12 = vpop.eup %2794  ;;  %2554 = vmatprep.subr.msk.bf16.mxu1 %vm3730_vm4, %v3720_v20 }
 0xad1   :  { %v1903_v17 = vmul.f32 %v2795_v12, %v2779_v1 }
 0xad3   :  { %2555 = vmatpush3.bf16.msk.msra.mxu1 %vm3730_vm4, %v3720_v20  ;;  %v1906_v37 = vpack.c.bf16 %v1903_v17, %v1902_v55 }
 0xad4   :  { %v2797_v60 = vpop.eup %2796 }
 0xad5   :  { %v2799_v38 = vpop.eup %2798  ;;  %v1905_v29 = vmul.f32 %v2797_v60, %v2783_v58  ;;  %2556 = vmatprep.mubr.msk.bf16.mxu1 %vm317_vm7, %v1906_v37 }
 0xad6   :  { %v1904_v63 = vmul.f32 %v2799_v38, %v2781_v42 }
 0xad8   :  { %v1907_v53 = vpack.c.bf16 %v1905_v29, %v1904_v63 }
 0xada   :  { %2557 = vmatmul.mubr.msk.bf16.vlgmr.msra.gmra.mxu1 %vm317_vm7, %v1907_v53 }
 0xb8e   :  { %v2550_v62 = vpop.f32.mrf.mxu1 }
 0xb90   :  { %v2054_v36 = vpop.f32.mrf.mxu1 }
 0xb92   :  { %v2551_v61 = vpop.f32.mrf.mxu1 }
 0xb94   :  { %v2057_v56 = vpop.f32.mrf.mxu1 }
 0xb9a   :  { %v2558_v6 = vpop.f32.mrf.mxu1 }
 0xb9b   :  { %v2118_v52 = vadd.f32 %v2558_v6, %v2550_v62 }
 0xb9c   :  { %v2109_v5 = vpop.f32.mrf.mxu1 }
 0xb9d   :  { %v2110_v32 = vadd.f32 %v2109_v5, %v2054_v36 }
 0xb9e   :  { %v2559_v22 = vpop.f32.mrf.mxu1 }
 0xb9f   :  { %2128 = vrot.lane.b32.xlu1 %v2110_v32, %s2957_s5  ;;  %v2121_v46 = vadd.f32 %v2559_v22, %v2551_v61 }
 0xba0   :  { %v2112_v20 = vpop.f32.mrf.mxu1 }
 0xba1   :  { %v2113_v19 = vadd.f32 %v2112_v20, %v2057_v56 }
 0xba3   :  { %2130 = vrot.lane.b32.xlu0 %v2113_v19, %s2957_s5  ;;  %2132 = vrot.lane.b32.xlu1 %v2118_v52, %s2957_s5 }
 0xba7   :  { %2134 = vrot.lane.b32.xlu1 %v2121_v46, %s2957_s5 }
 0xc11   :  { %v2129_v34 = vpop.permute.xlu1 %2128 }
 0xc12   :  { %v2140_v2 = vadd.f32 %v2129_v34, %v2110_v32 }
 0xc14   :  { %v2144_v48 = vmul.f32 0.5, %v2140_v2 }
 0xc15   :  { %v2131_v40 = vpop.permute.xlu0 %2130  ;;  %v2133_v30 = vpop.permute.xlu1 %2132 }
 0xc16   :  { %v2149_v7 = vsel %vm2148_vm6, %v2144_v48, 0.0  ;;  %v2141_v8 = vadd.f32 %v2131_v40, %v2113_v19  ;;  %v2142_v9 = vadd.f32 %v2133_v30, %v2118_v52 }
 0xc17   :  { %v3789_v31 = vadd.f32 %v2349_v33, %v2149_v7 }
 0xc18   :  { %v2145_v28 = vmul.f32 0.5, %v2141_v8  ;;  %v2146_v10 = vmul.f32 0.5, %v2142_v9 }
 0xc19   :  { %v2135_v50 = vpop.permute.xlu1 %2134  ;;  %v2166_v51 = vsel %vm1908_vm11, %v3789_v31, -1e+30 }
 0xc1a   :  { %v2150_v18 = vsel %vm2148_vm6, %v2145_v28, 0.0  ;;  %v2151_v14 = vsel %vm2148_vm6, %v2146_v10, 0.0  ;;  %v2143_v21 = vadd.f32 %v2135_v50, %v2121_v46  ;;  %2170 = vmax.xlane.f32.xlu0 %v2166_v51 }
 0xc1b   :  { %v3796_v1 = vadd.f32 %v2349_v33, %v2150_v18  ;;  %v2162_v11 = vadd.f32 %v2349_v33, %v2151_v14 }
 0xc1c   :  { %v2147_v42 = vmul.f32 0.5, %v2143_v21 }
 0xc1d   :  { %v2167_v58 = vsel %vm1908_vm11, %v3796_v1, -1e+30  ;;  %v2168_v49 = vsel %vm1908_vm11, %v2162_v11, -1e+30 }
 0xc1e   :  { %v2152_v3 = vsel %vm2148_vm6, %v2147_v42, 0.0  ;;  %2172 = vmax.xlane.f32.xlu1 %v2167_v58  ;;  %2174 = vmax.xlane.f32.xlu0 %v2168_v49 }
 0xc1f   :  { %v2163_v23 = vadd.f32 %v2349_v33, %v2152_v3 }
 0xc21   :  { %v2169_v41 = vsel %vm1908_vm11, %v2163_v23, -1e+30 }
 0xc22   :  { %2176 = vmax.xlane.f32.xlu0 %v2169_v41 }
 0xca3   :  { %v2171_v0 = vpop.xlane.xlu0 %2170 }
 0xca4   :  { %v2178_v47 = vsub.f32 %v3789_v31, %v2171_v0 }
 0xca6   :  { %v2182_v26 = vmul.f32 1.442695, %v2178_v47 }
 0xca7   :  { %v2175_v45 = vpop.xlane.xlu0 %2174  ;;  %v2173_v44 = vpop.xlane.xlu1 %2172 }
 0xca8   :  { %2800 = vpow2.f32 %v2182_v26  ;;  %v2180_v57 = vsub.f32 %v2162_v11, %v2175_v45  ;;  %v2179_v59 = vsub.f32 %v3796_v1, %v2173_v44 }
 0xcaa   :  { %v2186_v4 = vmul.f32 1.442695, %v2180_v57  ;;  %v2184_v39 = vmul.f32 1.442695, %v2179_v59 }
 0xcab   :  { %v2177_v54 = vpop.xlane.xlu0 %2176 }
 0xcac   :  { %2802 = vpow2.f32 %v2186_v4  ;;  %v2181_v25 = vsub.f32 %v2163_v23, %v2177_v54 }
 0xcad   :  { %2804 = vpow2.f32 %v2184_v39 }
 0xcae   :  { %v2188_v15 = vmul.f32 1.442695, %v2181_v25 }
 0xcb0   :  { %2806 = vpow2.f32 %v2188_v15 }
 0xcb5   :  { %v2801_v43 = vpop.eup %2800 }
 0xcb6   :  { %v2190_v35 = vsel %vm1908_vm11, %v2801_v43, 0.0 }
 0xcb7   :  { %2194 = vadd.xlane.f32.xlu1 %v2190_v35 }
 0xcb9   :  { %v2803_v24 = vpop.eup %2802 }
 0xcba   :  { %v2805_v27 = vpop.eup %2804  ;;  %v2192_v16 = vsel %vm1908_vm11, %v2803_v24, 0.0 }
 0xcbb   :  { %2198 = vadd.xlane.f32.xlu1 %v2192_v16  ;;  %v2191_v12 = vsel %vm1908_vm11, %v2805_v27, 0.0 }
 0xcbc   :  { %2196 = vadd.xlane.f32.xlu0 %v2191_v12 }
 0xcbd   :  { %v2807_v55 = vpop.eup %2806 }
 0xcbe   :  { %v2193_v17 = vsel %vm1908_vm11, %v2807_v55, 0.0 }
 0xcc0   :  { %2200 = vadd.xlane.f32.xlu0 %v2193_v17 }
 0xd40   :  { %v2195_v60 = vpop.xlane.xlu1 %2194 }
 0xd41   :  { %2808 = vlog2.f32 %v2195_v60 }
 0xd44   :  { %v2199_v37 = vpop.xlane.xlu1 %2198 }
 0xd45   :  { %v2197_v38 = vpop.xlane.xlu0 %2196  ;;  %2810 = vlog2.f32 %v2199_v37 }
 0xd46   :  { %2812 = vlog2.f32 %v2197_v38 }
 0xd49   :  { %v2201_v29 = vpop.xlane.xlu0 %2200 }
 0xd4a   :  { %2814 = vlog2.f32 %v2201_v29 }
 0xd4e   :  { %v2809_v63 = vpop.eup %2808 }
 0xd4f   :  { %v2203_v53 = vmul.f32 0.6931472, %v2809_v63 }
 0xd51   :  { %v2210_v62 = vadd.f32 %v2203_v53, %v2171_v0 }
 0xd52   :  { %v2811_v36 = vpop.eup %2810 }
 0xd53   :  { %v2813_v61 = vpop.eup %2812  ;;  %v2214_v56 = vsub.f32 %v3789_v31, %v2210_v62  ;;  %v2207_v6 = vmul.f32 0.6931472, %v2811_v36 }
 0xd54   :  { %v2205_v5 = vmul.f32 0.6931472, %v2813_v61 }
 0xd55   :  { %2218 = vst [vmem:[#allocation11] sm:$0xff] %v2214_v56  ;;  %v2212_v13 = vadd.f32 %v2207_v6, %v2175_v45 }
 0xd56   :  { %v2211_v32 = vadd.f32 %v2205_v5, %v2173_v44 }
 0xd57   :  { %v2815_v22 = vpop.eup %2814  ;;  %v2216_v20 = vsub.f32 %v2162_v11, %v2212_v13 }
 0xd58   :  { %v2215_v52 = vsub.f32 %v3796_v1, %v2211_v32  ;;  %v2209_v19 = vmul.f32 0.6931472, %v2815_v22 }
 0xd59   :  { %2220 = vst [vmem:[#allocation11 + $0x10] sm:$0xff] %v2216_v20 }
 0xd5a   :  { %2219 = vst [vmem:[#allocation11 + $0x8] sm:$0xff] %v2215_v52  ;;  %v2213_v46 = vadd.f32 %v2209_v19, %v2177_v54 }
 0xd5c   :  { %v2217_v34 = vsub.f32 %v2163_v23, %v2213_v46 }
 0xd5e   :  { %2221 = vst [vmem:[#allocation11 + $0x18] sm:$0xff] %v2217_v34 }
 0xd5f   :  { %2927 = shalt.err (!%p2924_p1)
}
 0xd60   :  { %s2959_s12 = smov 128   ;;  %s2960_s13 = smov 8  }
 0xd61   :  { %2233 = dma.vmem_to_hbm [thread:$0]  %s2228_s10, 512, %s3829_s8, [#allocation4], %s2959_s12, %s2959_s12, %s2960_s13  }
 0xd62   :  { %2942 = dma.done.wait [#allocation4], 512  }
 0xd63   :  { %2943 = vsyncadd [#allocation4], 4294966784 }
 0xd64   :  { %2237 = vsyncpa [#allocation3], 1 }
 0xd65   :  { %2238 = vsyncpa [#allocation6], 1 }
 0xd66   :  { %2239 = vsyncpa [#allocation9], 1 }
 0xd67   :  { %2240 = vsyncpa [#allocation4], 1 }

</bundles_post_ra>
